<compile_context>
chip_gen: v5e
topology: v5e:2x2
jax: 0.10.0
libtpu: 0.0.40
codegen_flags: <defaults>
</compile_context>

<pallas_src>
import math
import functools

import jax
import jax.numpy as jnp
from jax.experimental import pallas as pl
from jax.experimental.pallas import tpu as pltpu


# ----------------------------- tiling helpers -----------------------------

def _tile(dim, pref):
    """Use the preferred tile if it divides dim, otherwise fall back to the full extent."""
    return pref if (dim >= pref and dim % pref == 0) else dim


# ----------------------------- Pallas kernels -----------------------------

def _matmul_kernel(x_ref, w_ref, b_ref, o_ref, acc_ref, *, relu):
    """K-tiled matmul with f32 accumulator; bias (+ optional ReLU) in the finalize step."""
    @pl.when(pl.program_id(2) == 0)
    def _():
        acc_ref[...] = jnp.zeros_like(acc_ref)

    acc_ref[...] += jnp.dot(x_ref[...], w_ref[...],
                            preferred_element_type=jnp.float32)

    @pl.when(pl.program_id(2) == pl.num_programs(2) - 1)
    def _():
        y = acc_ref[...] + b_ref[...]
        if relu:
            y = jnp.maximum(y, 0.0)
        o_ref[...] = y.astype(o_ref.dtype)


def _add_layernorm_kernel(x_ref, r_ref, g_ref, b_ref, o_ref):
    """Fused residual-add + LayerNorm (statistics in f32)."""
    x = x_ref[...].astype(jnp.float32) + r_ref[...].astype(jnp.float32)
    mu = jnp.mean(x, axis=-1, keepdims=True)
    var = jnp.mean(jnp.square(x - mu), axis=-1, keepdims=True)
    y = (x - mu) * jax.lax.rsqrt(var + 1e-5) * g_ref[...] + b_ref[...]
    o_ref[...] = y.astype(o_ref.dtype)


def _ffn_kernel(x_ref, w1_ref, b1_ref, w2_ref, b2_ref, o_ref):
    """Fused FFN: relu(x @ W1 + b1) @ W2 + b2 ; the [tm, Dff] intermediate stays in VMEM."""
    h = jnp.dot(x_ref[...], w1_ref[...], preferred_element_type=jnp.float32) + b1_ref[...]
    h = jnp.maximum(h, 0.0)
    y = jnp.dot(h.astype(w2_ref.dtype), w2_ref[...],
                preferred_element_type=jnp.float32) + b2_ref[...]
    o_ref[...] = y.astype(o_ref.dtype)


def _attend_heads(q, k, v, kpad_add, num_heads, causal):
    """Per-head attention on lane-dense [S, D] tiles (heads split in-register).

    q: [Sq, D] bf16, k/v: [Sk, D] bf16, kpad_add: [1, Sk] f32 additive key-pad bias.
    Returns f32 [Sq, D].
    """
    sq, d = q.shape
    sk = k.shape[0]
    dh = d // num_heads
    scale = 1.0 / math.sqrt(dh)
    neg = jnp.float32(-1e9)

    if causal:
        qi = jax.lax.broadcasted_iota(jnp.int32, (sq, sk), 0)
        ki = jax.lax.broadcasted_iota(jnp.int32, (sq, sk), 1)
        causal_mask = ki > qi

    outs = []
    for h in range(num_heads):          # static unroll: num_heads is a Python int
        sl = slice(h * dh, (h + 1) * dh)
        s = jax.lax.dot_general(q[:, sl], k[:, sl],
                                (((1,), (1,)), ((), ())),
                                preferred_element_type=jnp.float32) * scale
        s = s + kpad_add                # [1, Sk] broadcast over queries
        if causal:
            s = jnp.where(causal_mask, neg, s)
        s = s - jnp.max(s, axis=-1, keepdims=True)
        p = jnp.exp(s)
        p = p * pl.reciprocal(jnp.sum(p, axis=-1, keepdims=True), approx=True)
        outs.append(jnp.dot(p.astype(v.dtype), v[:, sl],
                            preferred_element_type=jnp.float32))
    return jnp.concatenate(outs, axis=-1)


def _self_attn_kernel(qkv_ref, kpad_ref, o_ref, *, d_model, num_heads, causal):
    # qkv_ref: [S, 3D] (leading batch dim squeezed by BlockSpec), kpad_ref: [1, S]
    x = qkv_ref[...]
    d = d_model
    out = _attend_heads(x[:, :d], x[:, d:2 * d], x[:, 2 * d:],
                        kpad_ref[...], num_heads, causal)
    o_ref[...] = out.astype(o_ref.dtype)


def _cross_attn_kernel(q_ref, kv_ref, kpad_ref, o_ref, *, d_model, num_heads):
    # q_ref: [Sq, D], kv_ref: [Sk, 2D], kpad_ref: [1, Sk]
    q = q_ref[...]
    kv = kv_ref[...]
    d = d_model
    out = _attend_heads(q, kv[:, :d], kv[:, d:], kpad_ref[...], num_heads, False)
    o_ref[...] = out.astype(o_ref.dtype)


# ----------------------------- kernel wrappers -----------------------------

def linear(x2d, w, b, relu=False, out_dtype=jnp.bfloat16):
    """Tiled y = x @ w + b. bf16 MXU inputs, f32 accumulation, K axis last + 'arbitrary'."""
    M, K = x2d.shape
    N = w.shape[1]
    tm = _tile(M, 256)
    tn = _tile(N, 256)
    tk = _tile(K, 512)
    grid = (M // tm, N // tn, K // tk)
    return pl.pallas_call(
        functools.partial(_matmul_kernel, relu=relu),
        grid=grid,
        in_specs=[
            pl.BlockSpec((tm, tk), lambda i, j, k: (i, k)),
            pl.BlockSpec((tk, tn), lambda i, j, k: (k, j)),
            pl.BlockSpec((1, tn), lambda i, j, k: (0, j)),
        ],
        out_specs=pl.BlockSpec((tm, tn), lambda i, j, k: (i, j)),
        out_shape=jax.ShapeDtypeStruct((M, N), out_dtype),
        scratch_shapes=[pltpu.VMEM((tm, tn), jnp.float32)],
        compiler_params=pltpu.CompilerParams(
            dimension_semantics=("parallel", "parallel", "arbitrary")),
    )(x2d.astype(jnp.bfloat16), w.astype(jnp.bfloat16),
      b.reshape(1, N).astype(jnp.float32))


def add_layernorm(x2d, r2d, g, b):
    """Fused (x + r) -> LayerNorm, row-tiled."""
    M, D = x2d.shape
    tm = _tile(M, 512)
    return pl.pallas_call(
        _add_layernorm_kernel,
        grid=(M // tm,),
        in_specs=[
            pl.BlockSpec((tm, D), lambda i: (i, 0)),
            pl.BlockSpec((tm, D), lambda i: (i, 0)),
            pl.BlockSpec((1, D), lambda i: (0, 0)),
            pl.BlockSpec((1, D), lambda i: (0, 0)),
        ],
        out_specs=pl.BlockSpec((tm, D), lambda i: (i, 0)),
        out_shape=jax.ShapeDtypeStruct((M, D), jnp.bfloat16),
        compiler_params=pltpu.CompilerParams(dimension_semantics=("parallel",)),
    )(x2d, r2d, g.reshape(1, D).astype(jnp.float32), b.reshape(1, D).astype(jnp.float32))


def ffn(x2d, w1, b1, w2, b2):
    """Fused FFN; weights are resident blocks, rows are tiled over the grid."""
    M, D = x2d.shape
    Dff = w1.shape[1]
    tm = _tile(M, 256)
    # TODO(synk): for very large Dff the W1/W2 resident blocks should also be K-tiled.
    return pl.pallas_call(
        _ffn_kernel,
        grid=(M // tm,),
        in_specs=[
            pl.BlockSpec((tm, D), lambda i: (i, 0)),
            pl.BlockSpec((D, Dff), lambda i: (0, 0)),
            pl.BlockSpec((1, Dff), lambda i: (0, 0)),
            pl.BlockSpec((Dff, D), lambda i: (0, 0)),
            pl.BlockSpec((1, D), lambda i: (0, 0)),
        ],
        out_specs=pl.BlockSpec((tm, D), lambda i: (i, 0)),
        out_shape=jax.ShapeDtypeStruct((M, D), jnp.bfloat16),
        compiler_params=pltpu.CompilerParams(dimension_semantics=("parallel",)),
    )(x2d.astype(jnp.bfloat16), w1.astype(jnp.bfloat16),
      b1.reshape(1, Dff).astype(jnp.float32),
      w2.astype(jnp.bfloat16), b2.reshape(1, D).astype(jnp.float32))


def self_attention(qkv, kpad_add, d_model, num_heads, causal):
    # qkv: [B, S, 3D] bf16 (fused projection), kpad_add: [B, 1, S] f32 additive pad bias.
    B, S, D3 = qkv.shape
    # TODO(synk): for long sequences (>~2k) this should become a flash-style KV-tiled loop.
    return pl.pallas_call(
        functools.partial(_self_attn_kernel, d_model=d_model,
                          num_heads=num_heads, causal=causal),
        grid=(B,),
        in_specs=[
            pl.BlockSpec((None, S, D3), lambda b: (b, 0, 0)),
            pl.BlockSpec((None, 1, S), lambda b: (b, 0, 0)),
        ],
        out_specs=pl.BlockSpec((None, S, d_model), lambda b: (b, 0, 0)),
        out_shape=jax.ShapeDtypeStruct((B, S, d_model), jnp.bfloat16),
        compiler_params=pltpu.CompilerParams(dimension_semantics=("parallel",)),
    )(qkv, kpad_add)


def cross_attention(q, kv, kpad_add, d_model, num_heads):
    # q: [B, Sq, D], kv: [B, Sk, 2D], kpad_add: [B, 1, Sk]
    B, Sq, D = q.shape
    Sk = kv.shape[1]
    return pl.pallas_call(
        functools.partial(_cross_attn_kernel, d_model=d_model, num_heads=num_heads),
        grid=(B,),
        in_specs=[
            pl.BlockSpec((None, Sq, D), lambda b: (b, 0, 0)),
            pl.BlockSpec((None, Sk, 2 * d_model), lambda b: (b, 0, 0)),
            pl.BlockSpec((None, 1, Sk), lambda b: (b, 0, 0)),
        ],
        out_specs=pl.BlockSpec((None, Sq, d_model), lambda b: (b, 0, 0)),
        out_shape=jax.ShapeDtypeStruct((B, Sq, d_model), jnp.bfloat16),
        compiler_params=pltpu.CompilerParams(dimension_semantics=("parallel",)),
    )(q, kv, kpad_add)


# ----------------------------- model glue (plain JAX) -----------------------------

def sinusoid_pos(max_len, D):
    pos = jnp.arange(max_len, dtype=jnp.float32)[:, None]
    i = jnp.arange(D)[None, :]
    angle = pos / jnp.power(10000.0, (2 * (i // 2)).astype(jnp.float32) / D)
    return jnp.where(i % 2 == 0, jnp.sin(angle), jnp.cos(angle)).astype(jnp.float32)


def embed(seq, emb_table, pos_enc, pad_id):
    # TODO(synk): the embedding gather stays in XLA (no clean rectangular-BlockSpec form).
    D = emb_table.shape[1]
    x = jnp.take(emb_table, seq, axis=0) * jnp.sqrt(jnp.float32(D))
    x = x + pos_enc[None, :seq.shape[1], :]
    return x.astype(jnp.bfloat16), (seq == pad_id)


def pad_to_additive(pad_mask):
    # [B, S] bool -> [B, 1, S] f32 additive key-pad bias (0 or -1e9)
    return jnp.where(pad_mask, -1e9, 0.0).astype(jnp.float32)[:, None, :]


def encoder_block(x2d, src_kpad_add, p, B, S, num_heads):
    D = x2d.shape[1]
    qkv = linear(x2d, p["attn"]["w_qkv"], p["attn"]["b_qkv"])
    a = self_attention(qkv.reshape(B, S, 3 * D), src_kpad_add, D, num_heads, causal=False)
    a = linear(a.reshape(B * S, D), p["attn"]["wo"], p["attn"]["bo"])
    x2d = add_layernorm(x2d, a, p["ln1_g"], p["ln1_b"])
    h = ffn(x2d, p["w1"], p["b1"], p["w2"], p["b2"])
    x2d = add_layernorm(x2d, h, p["ln2_g"], p["ln2_b"])
    return x2d


def decoder_block(x2d, tgt_kpad_add, enc2d, src_kpad_add, p, B, S_tg, S_in, num_heads):
    D = x2d.shape[1]
    qkv = linear(x2d, p["self_attn"]["w_qkv"], p["self_attn"]["b_qkv"])
    a = self_attention(qkv.reshape(B, S_tg, 3 * D), tgt_kpad_add, D, num_heads, causal=True)
    a = linear(a.reshape(B * S_tg, D), p["self_attn"]["wo"], p["self_attn"]["bo"])
    x2d = add_layernorm(x2d, a, p["ln1_g"], p["ln1_b"])

    q = linear(x2d, p["cross_attn"]["wq"], p["cross_attn"]["bq"])
    kv = linear(enc2d, p["cross_attn"]["w_kv"], p["cross_attn"]["b_kv"])
    c = cross_attention(q.reshape(B, S_tg, D), kv.reshape(B, S_in, 2 * D),
                        src_kpad_add, D, num_heads)
    c = linear(c.reshape(B * S_tg, D), p["cross_attn"]["wo"], p["cross_attn"]["bo"])
    x2d = add_layernorm(x2d, c, p["ln2_g"], p["ln2_b"])

    h = ffn(x2d, p["w1"], p["b1"], p["w2"], p["b2"])
    x2d = add_layernorm(x2d, h, p["ln3_g"], p["ln3_b"])
    return x2d


def transformer_forward(params, input_seq, target_seq, *, pad_id, num_heads):
    """Equivalent of Transformer.forward(..., train=True) -> logits [B, S_tgt, vocab]."""
    # TODO(synk): dropout (training regularization) is not implemented.
    B, S_in = input_seq.shape
    S_tg = target_seq.shape[1]
    D = params["src_emb"].shape[1]
    pe = sinusoid_pos(max(S_in, S_tg), D)

    # InputEmbedding + encoder stack
    x, src_pad = embed(input_seq, params["src_emb"], pe, pad_id)
    src_kpad_add = pad_to_additive(src_pad)                       # [B, 1, S_in]
    enc = x.reshape(B * S_in, D)
    for p in params["enc"]:
        enc = encoder_block(enc, src_kpad_add, p, B, S_in, num_heads)

    # TargetEmbedding + decoder stack (causal mask generated inside the attention kernel)
    y, tgt_pad = embed(target_seq, params["tgt_emb"], pe, pad_id)
    tgt_kpad_add = pad_to_additive(tgt_pad)                       # [B, 1, S_tg]
    dec = y.reshape(B * S_tg, D)
    for p in params["dec"]:
        dec = decoder_block(dec, tgt_kpad_add, enc, src_kpad_add, p,
                            B, S_tg, S_in, num_heads)

    # DecoderHeadLayer: projection to vocab logits (f32 output)
    logits = linear(dec, params["w_head"], params["b_head"], out_dtype=jnp.float32)
    return logits.reshape(B, S_tg, -1)

# TODO(synk): the train=False autoregressive greedy-decode branch (data-dependent early
# break on eos/pad) is not implemented; only the train=True forward is reproduced.


# ----------------------------- deterministic params -----------------------------

def init_params(key, vocab, D, H, Dff, num_blocks):
    keys = iter(jax.random.split(key, 256))

    def dense(fan_in, fan_out):
        w = jax.random.normal(next(keys), (fan_in, fan_out), jnp.float32) / math.sqrt(fan_in)
        return w, jnp.zeros((fan_out,), jnp.float32)

    def self_attn_p():
        wq, bq = dense(D, D)
        wk, bk = dense(D, D)
        wv, bv = dense(D, D)
        wo, bo = dense(D, D)
        return {"w_qkv": jnp.concatenate([wq, wk, wv], axis=1),
                "b_qkv": jnp.concatenate([bq, bk, bv]),
                "wo": wo, "bo": bo}

    def cross_attn_p():
        wq, bq = dense(D, D)
        wk, bk = dense(D, D)
        wv, bv = dense(D, D)
        wo, bo = dense(D, D)
        return {"wq": wq, "bq": bq,
                "w_kv": jnp.concatenate([wk, wv], axis=1),
                "b_kv": jnp.concatenate([bk, bv]),
                "wo": wo, "bo": bo}

    def enc_p():
        w1, b1 = dense(D, Dff)
        w2, b2 = dense(Dff, D)
        return {"attn": self_attn_p(),
                "ln1_g": jnp.ones((D,)), "ln1_b": jnp.zeros((D,)),
                "w1": w1, "b1": b1, "w2": w2, "b2": b2,
                "ln2_g": jnp.ones((D,)), "ln2_b": jnp.zeros((D,))}

    def dec_p():
        w1, b1 = dense(D, Dff)
        w2, b2 = dense(Dff, D)
        return {"self_attn": self_attn_p(), "cross_attn": cross_attn_p(),
                "ln1_g": jnp.ones((D,)), "ln1_b": jnp.zeros((D,)),
                "ln2_g": jnp.ones((D,)), "ln2_b": jnp.zeros((D,)),
                "ln3_g": jnp.ones((D,)), "ln3_b": jnp.zeros((D,)),
                "w1": w1, "b1": b1, "w2": w2, "b2": b2}

    wh, bh = dense(D, vocab)
    return {
        "src_emb": (jax.random.normal(next(keys), (vocab, D)) * 0.02).astype(jnp.float32),
        "tgt_emb": (jax.random.normal(next(keys), (vocab, D)) * 0.02).astype(jnp.float32),
        "enc": [enc_p() for _ in range(num_blocks)],
        "dec": [dec_p() for _ in range(num_blocks)],
        "w_head": wh, "b_head": bh,
    }


# ----------------------------- main -----------------------------

if __name__ == "__main__":
    B, S, D, H, Dff, vocab, num_blocks = 2, 8, 32, 2, 64, 64, 2
    pad_id, bos_id, eos_id = 0, 1, 2

    key = jax.random.PRNGKey(0)
    k_in, k_tg, k_p = jax.random.split(key, 3)

    input_seq = jax.random.randint(k_in, (B, S), 3, vocab, dtype=jnp.int32)
    target_seq = jax.random.randint(k_tg, (B, S), 3, vocab, dtype=jnp.int32)
    input_seq = input_seq.at[:, -2:].set(pad_id)          # exercise pad masking
    target_seq = target_seq.at[:, 0].set(bos_id)
    target_seq = target_seq.at[:, -1].set(pad_id)

    params = init_params(k_p, vocab, D, H, Dff, num_blocks)

    fwd = jax.jit(functools.partial(transformer_forward, pad_id=pad_id, num_heads=H))
    logits = fwd(params, input_seq, target_seq)
    jax.block_until_ready(logits)

    assert logits.shape == (B, S, vocab), logits.shape
    assert bool(jnp.all(jnp.isfinite(logits)))
    print("KERNEL_OK")
</pallas_src>

<mosaic_0001>
module attributes {stable_mosaic.version = 11 : i64} {
  func.func @_self_attn_kernel(%arg0: i32, %arg1: memref<1x8x96xbf16, #tpu.memory_space<vmem>>, %arg2: memref<1x1x8xf32, #tpu.memory_space<vmem>>, %arg3: memref<1x8x32xbf16, #tpu.memory_space<vmem>>) attributes {dimension_semantics = [#tpu.dimension_semantics<parallel>], iteration_bounds = array<i64: 2>, scalar_prefetch = 0 : i64, scratch_operands = 0 : i64, tpu.core_type = #tpu.core_type<tc>, window_params = [{transform_indices = @transform_0, window_bounds = array<i64: 1, 8, 96>}, {transform_indices = @transform_1, window_bounds = array<i64: 1, 1, 8>}, {transform_indices = @transform_2, window_bounds = array<i64: 1, 8, 32>}]} {
    %c0 = arith.constant 0 : index
    %c0_0 = arith.constant 0 : index
    %c0_1 = arith.constant 0 : index
    %0 = vector.load %arg1[%c0, %c0_0, %c0_1] : memref<1x8x96xbf16, #tpu.memory_space<vmem>>, vector<1x8x96xbf16>
    %1 = vector.shape_cast %0 : vector<1x8x96xbf16> to vector<8x96xbf16>
    %2 = vector.extract_strided_slice %1 {offsets = [0, 0], sizes = [8, 32], strides = [1, 1]} : vector<8x96xbf16> to vector<8x32xbf16>
    %3 = vector.extract_strided_slice %1 {offsets = [0, 32], sizes = [8, 32], strides = [1, 1]} : vector<8x96xbf16> to vector<8x32xbf16>
    %4 = vector.extract_strided_slice %1 {offsets = [0, 64], sizes = [8, 32], strides = [1, 1]} : vector<8x96xbf16> to vector<8x32xbf16>
    %c0_2 = arith.constant 0 : index
    %c0_3 = arith.constant 0 : index
    %c0_4 = arith.constant 0 : index
    %5 = vector.load %arg2[%c0_2, %c0_3, %c0_4] : memref<1x1x8xf32, #tpu.memory_space<vmem>>, vector<1x1x8xf32>
    %6 = vector.shape_cast %5 : vector<1x1x8xf32> to vector<1x8xf32>
    %7 = vector.extract_strided_slice %2 {offsets = [0, 0], sizes = [8, 16], strides = [1, 1]} : vector<8x32xbf16> to vector<8x16xbf16>
    %8 = vector.extract_strided_slice %3 {offsets = [0, 0], sizes = [8, 16], strides = [1, 1]} : vector<8x32xbf16> to vector<8x16xbf16>
    %cst = arith.constant dense<0.000000e+00> : vector<8x8xf32>
    %9 = tpu.matmul %7, %8, %cst {dimension_numbers = #tpu.dot_dimension_numbers<[1], [1], [0], [0], [0, 0, 1, 0], [], []>} : vector<8x16xbf16>, vector<8x16xbf16>, vector<8x8xf32> -> vector<8x8xf32>
    %cst_5 = arith.constant 2.500000e-01 : f32
    %10 = vector.broadcast %cst_5 : f32 to vector<8x8xf32>
    %11 = arith.mulf %9, %10 : vector<8x8xf32>
    %12 = vector.broadcast %6 : vector<1x8xf32> to vector<8x8xf32>
    %13 = arith.addf %11, %12 : vector<8x8xf32>
    %cst_6 = arith.constant dense<0xFF800000> : vector<8xf32>
    %14 = vector.multi_reduction <maximumf>, %13, %cst_6 [1] : vector<8x8xf32> to vector<8xf32>
    %15 = vector.shape_cast %14 : vector<8xf32> to vector<8x1xf32>
    %16 = vector.broadcast %15 : vector<8x1xf32> to vector<8x8xf32>
    %17 = arith.subf %13, %16 : vector<8x8xf32>
    %18 = math.exp %17 : vector<8x8xf32>
    %cst_7 = arith.constant dense<0.000000e+00> : vector<8xf32>
    %19 = vector.multi_reduction <add>, %18, %cst_7 [1] : vector<8x8xf32> to vector<8xf32>
    %20 = vector.shape_cast %19 : vector<8xf32> to vector<8x1xf32>
    %21 = tpu.reciprocal %20 {approx = true} : vector<8x1xf32> -> vector<8x1xf32>
    %22 = vector.broadcast %21 : vector<8x1xf32> to vector<8x8xf32>
    %23 = arith.mulf %18, %22 : vector<8x8xf32>
    %24 = arith.truncf %23 : vector<8x8xf32> to vector<8x8xbf16>
    %25 = vector.extract_strided_slice %4 {offsets = [0, 0], sizes = [8, 16], strides = [1, 1]} : vector<8x32xbf16> to vector<8x16xbf16>
    %cst_8 = arith.constant dense<0.000000e+00> : vector<8x16xf32>
    %26 = tpu.matmul %24, %25, %cst_8 {dimension_numbers = #tpu.dot_dimension_numbers<[1], [0], [0], [1], [0, 0, 1, 1], [], []>} : vector<8x8xbf16>, vector<8x16xbf16>, vector<8x16xf32> -> vector<8x16xf32>
    %27 = vector.extract_strided_slice %2 {offsets = [0, 16], sizes = [8, 16], strides = [1, 1]} : vector<8x32xbf16> to vector<8x16xbf16>
    %28 = vector.extract_strided_slice %3 {offsets = [0, 16], sizes = [8, 16], strides = [1, 1]} : vector<8x32xbf16> to vector<8x16xbf16>
    %cst_9 = arith.constant dense<0.000000e+00> : vector<8x8xf32>
    %29 = tpu.matmul %27, %28, %cst_9 {dimension_numbers = #tpu.dot_dimension_numbers<[1], [1], [0], [0], [0, 0, 1, 0], [], []>} : vector<8x16xbf16>, vector<8x16xbf16>, vector<8x8xf32> -> vector<8x8xf32>
    %cst_10 = arith.constant 2.500000e-01 : f32
    %30 = vector.broadcast %cst_10 : f32 to vector<8x8xf32>
    %31 = arith.mulf %29, %30 : vector<8x8xf32>
    %32 = vector.broadcast %6 : vector<1x8xf32> to vector<8x8xf32>
    %33 = arith.addf %31, %32 : vector<8x8xf32>
    %cst_11 = arith.constant dense<0xFF800000> : vector<8xf32>
    %34 = vector.multi_reduction <maximumf>, %33, %cst_11 [1] : vector<8x8xf32> to vector<8xf32>
    %35 = vector.shape_cast %34 : vector<8xf32> to vector<8x1xf32>
    %36 = vector.broadcast %35 : vector<8x1xf32> to vector<8x8xf32>
    %37 = arith.subf %33, %36 : vector<8x8xf32>
    %38 = math.exp %37 : vector<8x8xf32>
    %cst_12 = arith.constant dense<0.000000e+00> : vector<8xf32>
    %39 = vector.multi_reduction <add>, %38, %cst_12 [1] : vector<8x8xf32> to vector<8xf32>
    %40 = vector.shape_cast %39 : vector<8xf32> to vector<8x1xf32>
    %41 = tpu.reciprocal %40 {approx = true} : vector<8x1xf32> -> vector<8x1xf32>
    %42 = vector.broadcast %41 : vector<8x1xf32> to vector<8x8xf32>
    %43 = arith.mulf %38, %42 : vector<8x8xf32>
    %44 = arith.truncf %43 : vector<8x8xf32> to vector<8x8xbf16>
    %45 = vector.extract_strided_slice %4 {offsets = [0, 16], sizes = [8, 16], strides = [1, 1]} : vector<8x32xbf16> to vector<8x16xbf16>
    %cst_13 = arith.constant dense<0.000000e+00> : vector<8x16xf32>
    %46 = tpu.matmul %44, %45, %cst_13 {dimension_numbers = #tpu.dot_dimension_numbers<[1], [0], [0], [1], [0, 0, 1, 1], [], []>} : vector<8x8xbf16>, vector<8x16xbf16>, vector<8x16xf32> -> vector<8x16xf32>
    %47 = tpu.concatenate %26, %46 in 1 : vector<8x16xf32>, vector<8x16xf32> -> vector<8x32xf32>
    %48 = arith.truncf %47 : vector<8x32xf32> to vector<8x32xbf16>
    %c0_14 = arith.constant 0 : index
    %c0_15 = arith.constant 0 : index
    %c0_16 = arith.constant 0 : index
    %49 = vector.load %arg3[%c0_14, %c0_15, %c0_16] : memref<1x8x32xbf16, #tpu.memory_space<vmem>>, vector<1x8x32xbf16>
    %50 = vector.shape_cast %49 : vector<1x8x32xbf16> to vector<8x32xbf16>
    %51 = vector.shape_cast %48 : vector<8x32xbf16> to vector<1x8x32xbf16>
    tpu.vector_store %arg3[%c0_14, %c0_15, %c0_16], %51 {strides = array<i32>} : memref<1x8x32xbf16, #tpu.memory_space<vmem>>, vector<1x8x32xbf16>,
    return
  }
  func.func @transform_0(%arg0: i32) -> (i32, i32, i32) {
    %c0_i32 = arith.constant 0 : i32
    %c0_i32_0 = arith.constant 0 : i32
    %c0_i32_1 = arith.constant 0 : i32
    return %arg0, %c0_i32, %c0_i32_0 : i32, i32, i32
  }
  func.func @transform_1(%arg0: i32) -> (i32, i32, i32) {
    %c0_i32 = arith.constant 0 : i32
    %c0_i32_0 = arith.constant 0 : i32
    %c0_i32_1 = arith.constant 0 : i32
    return %arg0, %c0_i32, %c0_i32_0 : i32, i32, i32
  }
  func.func @transform_2(%arg0: i32) -> (i32, i32, i32) {
    %c0_i32 = arith.constant 0 : i32
    %c0_i32_0 = arith.constant 0 : i32
    %c0_i32_1 = arith.constant 0 : i32
    return %arg0, %c0_i32, %c0_i32_0 : i32, i32, i32
  }
}

module attributes {stable_mosaic.version = 11 : i64} {
  func.func @_matmul_kernel(%arg0: i32, %arg1: i32, %arg2: i32, %arg3: memref<16x32xbf16, #tpu.memory_space<vmem>>, %arg4: memref<32x32xbf16, #tpu.memory_space<vmem>>, %arg5: memref<1x32xf32, #tpu.memory_space<vmem>>, %arg6: memref<16x32xbf16, #tpu.memory_space<vmem>>, %arg7: memref<16x32xf32, #tpu.memory_space<vmem>>) attributes {dimension_semantics = [#tpu.dimension_semantics<parallel>, #tpu.dimension_semantics<parallel>, #tpu.dimension_semantics<arbitrary>], iteration_bounds = array<i64: 1, 1, 1>, scalar_prefetch = 0 : i64, scratch_operands = 1 : i64, tpu.core_type = #tpu.core_type<tc>, window_params = [{transform_indices = @transform_0, window_bounds = array<i64: 16, 32>}, {transform_indices = @transform_1, window_bounds = array<i64: 32, 32>}, {transform_indices = @transform_2, window_bounds = array<i64: 1, 32>}, {transform_indices = @transform_3, window_bounds = array<i64: 16, 32>}]} {
    %c0_i32 = arith.constant 0 : i32
    %0 = arith.cmpi eq, %arg2, %c0_i32 : i32
    %1 = arith.extui %0 : i1 to i32
    %c0_i32_0 = arith.constant 0 : i32
    %2 = arith.cmpi ne, %1, %c0_i32_0 : i32
    scf.if %2 {
      %cst_10 = arith.constant 0.000000e+00 : f32
      %12 = vector.broadcast %cst_10 : f32 to vector<16x32xf32>
      %c0_11 = arith.constant 0 : index
      %c0_12 = arith.constant 0 : index
      %13 = vector.load %arg7[%c0_11, %c0_12] : memref<16x32xf32, #tpu.memory_space<vmem>>, vector<16x32xf32>
      tpu.vector_store %arg7[%c0_11, %c0_12], %12 {strides = array<i32>} : memref<16x32xf32, #tpu.memory_space<vmem>>, vector<16x32xf32>,
    } else {
    }
    %c0 = arith.constant 0 : index
    %c0_1 = arith.constant 0 : index
    %3 = vector.load %arg7[%c0, %c0_1] : memref<16x32xf32, #tpu.memory_space<vmem>>, vector<16x32xf32>
    %c0_2 = arith.constant 0 : index
    %c0_3 = arith.constant 0 : index
    %4 = vector.load %arg3[%c0_2, %c0_3] : memref<16x32xbf16, #tpu.memory_space<vmem>>, vector<16x32xbf16>
    %c0_4 = arith.constant 0 : index
    %c0_5 = arith.constant 0 : index
    %5 = vector.load %arg4[%c0_4, %c0_5] : memref<32x32xbf16, #tpu.memory_space<vmem>>, vector<32x32xbf16>
    %cst = arith.constant dense<0.000000e+00> : vector<16x32xf32>
    %6 = tpu.matmul %4, %5, %cst {dimension_numbers = #tpu.dot_dimension_numbers<[1], [0], [0], [1], [0, 0, 1, 1], [], []>} : vector<16x32xbf16>, vector<32x32xbf16>, vector<16x32xf32> -> vector<16x32xf32>
    %7 = arith.addf %3, %6 : vector<16x32xf32>
    %c0_6 = arith.constant 0 : index
    %c0_7 = arith.constant 0 : index
    %8 = vector.load %arg7[%c0_6, %c0_7] : memref<16x32xf32, #tpu.memory_space<vmem>>, vector<16x32xf32>
    tpu.vector_store %arg7[%c0_6, %c0_7], %7 {strides = array<i32>} : memref<16x32xf32, #tpu.memory_space<vmem>>, vector<16x32xf32>,
    %c0_i32_8 = arith.constant 0 : i32
    %9 = arith.cmpi eq, %arg2, %c0_i32_8 : i32
    %10 = arith.extui %9 : i1 to i32
    %c0_i32_9 = arith.constant 0 : i32
    %11 = arith.cmpi ne, %10, %c0_i32_9 : i32
    scf.if %11 {
      %c0_10 = arith.constant 0 : index
      %c0_11 = arith.constant 0 : index
      %12 = vector.load %arg7[%c0_10, %c0_11] : memref<16x32xf32, #tpu.memory_space<vmem>>, vector<16x32xf32>
      %c0_12 = arith.constant 0 : index
      %c0_13 = arith.constant 0 : index
      %13 = vector.load %arg5[%c0_12, %c0_13] : memref<1x32xf32, #tpu.memory_space<vmem>>, vector<1x32xf32>
      %14 = vector.broadcast %13 : vector<1x32xf32> to vector<16x32xf32>
      %15 = arith.addf %12, %14 : vector<16x32xf32>
      %16 = arith.truncf %15 : vector<16x32xf32> to vector<16x32xbf16>
      %c0_14 = arith.constant 0 : index
      %c0_15 = arith.constant 0 : index
      %17 = vector.load %arg6[%c0_14, %c0_15] : memref<16x32xbf16, #tpu.memory_space<vmem>>, vector<16x32xbf16>
      tpu.vector_store %arg6[%c0_14, %c0_15], %16 {strides = array<i32>} : memref<16x32xbf16, #tpu.memory_space<vmem>>, vector<16x32xbf16>,
    } else {
    }
    return
  }
  func.func @transform_0(%arg0: i32, %arg1: i32, %arg2: i32) -> (i32, i32) {
    %c0_i32 = arith.constant 0 : i32
    return %arg0, %arg2 : i32, i32
  }
  func.func @transform_1(%arg0: i32, %arg1: i32, %arg2: i32) -> (i32, i32) {
    %c0_i32 = arith.constant 0 : i32
    return %arg2, %arg1 : i32, i32
  }
  func.func @transform_2(%arg0: i32, %arg1: i32, %arg2: i32) -> (i32, i32) {
    %c0_i32 = arith.constant 0 : i32
    %c0_i32_0 = arith.constant 0 : i32
    return %c0_i32, %arg1 : i32, i32
  }
  func.func @transform_3(%arg0: i32, %arg1: i32, %arg2: i32) -> (i32, i32) {
    %c0_i32 = arith.constant 0 : i32
    return %arg0, %arg1 : i32, i32
  }
}

module attributes {stable_mosaic.version = 11 : i64} {
  func.func @_add_layernorm_kernel(%arg0: i32, %arg1: memref<16x32xbf16, #tpu.memory_space<vmem>>, %arg2: memref<16x32xbf16, #tpu.memory_space<vmem>>, %arg3: memref<1x32xf32, #tpu.memory_space<vmem>>, %arg4: memref<1x32xf32, #tpu.memory_space<vmem>>, %arg5: memref<16x32xbf16, #tpu.memory_space<vmem>>) attributes {dimension_semantics = [#tpu.dimension_semantics<parallel>], iteration_bounds = array<i64: 1>, scalar_prefetch = 0 : i64, scratch_operands = 0 : i64, tpu.core_type = #tpu.core_type<tc>, window_params = [{transform_indices = @transform_0, window_bounds = array<i64: 16, 32>}, {transform_indices = @transform_1, window_bounds = array<i64: 16, 32>}, {pipeline_mode = #tpu.pipeline_mode<synchronous>, transform_indices = @transform_2, window_bounds = array<i64: 1, 32>}, {pipeline_mode = #tpu.pipeline_mode<synchronous>, transform_indices = @transform_3, window_bounds = array<i64: 1, 32>}, {transform_indices = @transform_4, window_bounds = array<i64: 16, 32>}]} {
    %c0 = arith.constant 0 : index
    %c0_0 = arith.constant 0 : index
    %0 = vector.load %arg1[%c0, %c0_0] : memref<16x32xbf16, #tpu.memory_space<vmem>>, vector<16x32xbf16>
    %1 = arith.extf %0 : vector<16x32xbf16> to vector<16x32xf32>
    %c0_1 = arith.constant 0 : index
    %c0_2 = arith.constant 0 : index
    %2 = vector.load %arg2[%c0_1, %c0_2] : memref<16x32xbf16, #tpu.memory_space<vmem>>, vector<16x32xbf16>
    %3 = arith.extf %2 : vector<16x32xbf16> to vector<16x32xf32>
    %4 = arith.addf %1, %3 : vector<16x32xf32>
    %cst = arith.constant dense<0.000000e+00> : vector<16xf32>
    %5 = vector.multi_reduction <add>, %4, %cst [1] : vector<16x32xf32> to vector<16xf32>
    %6 = vector.shape_cast %5 : vector<16xf32> to vector<16x1xf32>
    %cst_3 = arith.constant 3.200000e+01 : f32
    %7 = vector.broadcast %cst_3 : f32 to vector<16x1xf32>
    %8 = arith.divf %6, %7 : vector<16x1xf32>
    %9 = vector.broadcast %8 : vector<16x1xf32> to vector<16x32xf32>
    %10 = arith.subf %4, %9 : vector<16x32xf32>
    %11 = arith.mulf %10, %10 : vector<16x32xf32>
    %cst_4 = arith.constant dense<0.000000e+00> : vector<16xf32>
    %12 = vector.multi_reduction <add>, %11, %cst_4 [1] : vector<16x32xf32> to vector<16xf32>
    %13 = vector.shape_cast %12 : vector<16xf32> to vector<16x1xf32>
    %cst_5 = arith.constant 3.200000e+01 : f32
    %14 = vector.broadcast %cst_5 : f32 to vector<16x1xf32>
    %15 = arith.divf %13, %14 : vector<16x1xf32>
    %16 = vector.broadcast %8 : vector<16x1xf32> to vector<16x32xf32>
    %17 = arith.subf %4, %16 : vector<16x32xf32>
    %cst_6 = arith.constant 9.99999974E-6 : f32
    %18 = vector.broadcast %cst_6 : f32 to vector<16x1xf32>
    %19 = arith.addf %15, %18 : vector<16x1xf32>
    %20 = math.rsqrt %19 : vector<16x1xf32>
    %21 = vector.broadcast %20 : vector<16x1xf32> to vector<16x32xf32>
    %22 = arith.mulf %17, %21 : vector<16x32xf32>
    %c0_7 = arith.constant 0 : index
    %c0_8 = arith.constant 0 : index
    %23 = vector.load %arg3[%c0_7, %c0_8] : memref<1x32xf32, #tpu.memory_space<vmem>>, vector<1x32xf32>
    %24 = vector.broadcast %23 : vector<1x32xf32> to vector<16x32xf32>
    %25 = arith.mulf %22, %24 : vector<16x32xf32>
    %c0_9 = arith.constant 0 : index
    %c0_10 = arith.constant 0 : index
    %26 = vector.load %arg4[%c0_9, %c0_10] : memref<1x32xf32, #tpu.memory_space<vmem>>, vector<1x32xf32>
    %27 = vector.broadcast %26 : vector<1x32xf32> to vector<16x32xf32>
    %28 = arith.addf %25, %27 : vector<16x32xf32>
    %29 = arith.truncf %28 : vector<16x32xf32> to vector<16x32xbf16>
    %c0_11 = arith.constant 0 : index
    %c0_12 = arith.constant 0 : index
    %30 = vector.load %arg5[%c0_11, %c0_12] : memref<16x32xbf16, #tpu.memory_space<vmem>>, vector<16x32xbf16>
    tpu.vector_store %arg5[%c0_11, %c0_12], %29 {strides = array<i32>} : memref<16x32xbf16, #tpu.memory_space<vmem>>, vector<16x32xbf16>,
    return
  }
  func.func @transform_0(%arg0: i32) -> (i32, i32) {
    %c0_i32 = arith.constant 0 : i32
    %c0_i32_0 = arith.constant 0 : i32
    return %arg0, %c0_i32 : i32, i32
  }
  func.func @transform_1(%arg0: i32) -> (i32, i32) {
    %c0_i32 = arith.constant 0 : i32
    %c0_i32_0 = arith.constant 0 : i32
    return %arg0, %c0_i32 : i32, i32
  }
  func.func @transform_2(%arg0: i32) -> (i32, i32) {
    %c0_i32 = arith.constant 0 : i32
    %c0_i32_0 = arith.constant 0 : i32
    %c0_i32_1 = arith.constant 0 : i32
    return %c0_i32, %c0_i32_0 : i32, i32
  }
  func.func @transform_3(%arg0: i32) -> (i32, i32) {
    %c0_i32 = arith.constant 0 : i32
    %c0_i32_0 = arith.constant 0 : i32
    %c0_i32_1 = arith.constant 0 : i32
    return %c0_i32, %c0_i32_0 : i32, i32
  }
  func.func @transform_4(%arg0: i32) -> (i32, i32) {
    %c0_i32 = arith.constant 0 : i32
    %c0_i32_0 = arith.constant 0 : i32
    return %arg0, %c0_i32 : i32, i32
  }
}

module attributes {stable_mosaic.version = 11 : i64} {
  func.func @_matmul_kernel(%arg0: i32, %arg1: i32, %arg2: i32, %arg3: memref<16x32xbf16, #tpu.memory_space<vmem>>, %arg4: memref<32x96xbf16, #tpu.memory_space<vmem>>, %arg5: memref<1x96xf32, #tpu.memory_space<vmem>>, %arg6: memref<16x96xbf16, #tpu.memory_space<vmem>>, %arg7: memref<16x96xf32, #tpu.memory_space<vmem>>) attributes {dimension_semantics = [#tpu.dimension_semantics<parallel>, #tpu.dimension_semantics<parallel>, #tpu.dimension_semantics<arbitrary>], iteration_bounds = array<i64: 1, 1, 1>, scalar_prefetch = 0 : i64, scratch_operands = 1 : i64, tpu.core_type = #tpu.core_type<tc>, window_params = [{transform_indices = @transform_0, window_bounds = array<i64: 16, 32>}, {transform_indices = @transform_1, window_bounds = array<i64: 32, 96>}, {transform_indices = @transform_2, window_bounds = array<i64: 1, 96>}, {transform_indices = @transform_3, window_bounds = array<i64: 16, 96>}]} {
    %c0_i32 = arith.constant 0 : i32
    %0 = arith.cmpi eq, %arg2, %c0_i32 : i32
    %1 = arith.extui %0 : i1 to i32
    %c0_i32_0 = arith.constant 0 : i32
    %2 = arith.cmpi ne, %1, %c0_i32_0 : i32
    scf.if %2 {
      %cst_10 = arith.constant 0.000000e+00 : f32
      %12 = vector.broadcast %cst_10 : f32 to vector<16x96xf32>
      %c0_11 = arith.constant 0 : index
      %c0_12 = arith.constant 0 : index
      %13 = vector.load %arg7[%c0_11, %c0_12] : memref<16x96xf32, #tpu.memory_space<vmem>>, vector<16x96xf32>
      tpu.vector_store %arg7[%c0_11, %c0_12], %12 {strides = array<i32>} : memref<16x96xf32, #tpu.memory_space<vmem>>, vector<16x96xf32>,
    } else {
    }
    %c0 = arith.constant 0 : index
    %c0_1 = arith.constant 0 : index
    %3 = vector.load %arg7[%c0, %c0_1] : memref<16x96xf32, #tpu.memory_space<vmem>>, vector<16x96xf32>
    %c0_2 = arith.constant 0 : index
    %c0_3 = arith.constant 0 : index
    %4 = vector.load %arg3[%c0_2, %c0_3] : memref<16x32xbf16, #tpu.memory_space<vmem>>, vector<16x32xbf16>
    %c0_4 = arith.constant 0 : index
    %c0_5 = arith.constant 0 : index
    %5 = vector.load %arg4[%c0_4, %c0_5] : memref<32x96xbf16, #tpu.memory_space<vmem>>, vector<32x96xbf16>
    %cst = arith.constant dense<0.000000e+00> : vector<16x96xf32>
    %6 = tpu.matmul %4, %5, %cst {dimension_numbers = #tpu.dot_dimension_numbers<[1], [0], [0], [1], [0, 0, 1, 1], [], []>} : vector<16x32xbf16>, vector<32x96xbf16>, vector<16x96xf32> -> vector<16x96xf32>
    %7 = arith.addf %3, %6 : vector<16x96xf32>
    %c0_6 = arith.constant 0 : index
    %c0_7 = arith.constant 0 : index
    %8 = vector.load %arg7[%c0_6, %c0_7] : memref<16x96xf32, #tpu.memory_space<vmem>>, vector<16x96xf32>
    tpu.vector_store %arg7[%c0_6, %c0_7], %7 {strides = array<i32>} : memref<16x96xf32, #tpu.memory_space<vmem>>, vector<16x96xf32>,
    %c0_i32_8 = arith.constant 0 : i32
    %9 = arith.cmpi eq, %arg2, %c0_i32_8 : i32
    %10 = arith.extui %9 : i1 to i32
    %c0_i32_9 = arith.constant 0 : i32
    %11 = arith.cmpi ne, %10, %c0_i32_9 : i32
    scf.if %11 {
      %c0_10 = arith.constant 0 : index
      %c0_11 = arith.constant 0 : index
      %12 = vector.load %arg7[%c0_10, %c0_11] : memref<16x96xf32, #tpu.memory_space<vmem>>, vector<16x96xf32>
      %c0_12 = arith.constant 0 : index
      %c0_13 = arith.constant 0 : index
      %13 = vector.load %arg5[%c0_12, %c0_13] : memref<1x96xf32, #tpu.memory_space<vmem>>, vector<1x96xf32>
      %14 = vector.broadcast %13 : vector<1x96xf32> to vector<16x96xf32>
      %15 = arith.addf %12, %14 : vector<16x96xf32>
      %16 = arith.truncf %15 : vector<16x96xf32> to vector<16x96xbf16>
      %c0_14 = arith.constant 0 : index
      %c0_15 = arith.constant 0 : index
      %17 = vector.load %arg6[%c0_14, %c0_15] : memref<16x96xbf16, #tpu.memory_space<vmem>>, vector<16x96xbf16>
      tpu.vector_store %arg6[%c0_14, %c0_15], %16 {strides = array<i32>} : memref<16x96xbf16, #tpu.memory_space<vmem>>, vector<16x96xbf16>,
    } else {
    }
    return
  }
  func.func @transform_0(%arg0: i32, %arg1: i32, %arg2: i32) -> (i32, i32) {
    %c0_i32 = arith.constant 0 : i32
    return %arg0, %arg2 : i32, i32
  }
  func.func @transform_1(%arg0: i32, %arg1: i32, %arg2: i32) -> (i32, i32) {
    %c0_i32 = arith.constant 0 : i32
    return %arg2, %arg1 : i32, i32
  }
  func.func @transform_2(%arg0: i32, %arg1: i32, %arg2: i32) -> (i32, i32) {
    %c0_i32 = arith.constant 0 : i32
    %c0_i32_0 = arith.constant 0 : i32
    return %c0_i32, %arg1 : i32, i32
  }
  func.func @transform_3(%arg0: i32, %arg1: i32, %arg2: i32) -> (i32, i32) {
    %c0_i32 = arith.constant 0 : i32
    return %arg0, %arg1 : i32, i32
  }
}

module attributes {stable_mosaic.version = 11 : i64} {
  func.func @_ffn_kernel(%arg0: i32, %arg1: memref<16x32xbf16, #tpu.memory_space<vmem>>, %arg2: memref<32x64xbf16, #tpu.memory_space<vmem>>, %arg3: memref<1x64xf32, #tpu.memory_space<vmem>>, %arg4: memref<64x32xbf16, #tpu.memory_space<vmem>>, %arg5: memref<1x32xf32, #tpu.memory_space<vmem>>, %arg6: memref<16x32xbf16, #tpu.memory_space<vmem>>) attributes {dimension_semantics = [#tpu.dimension_semantics<parallel>], iteration_bounds = array<i64: 1>, scalar_prefetch = 0 : i64, scratch_operands = 0 : i64, tpu.core_type = #tpu.core_type<tc>, window_params = [{transform_indices = @transform_0, window_bounds = array<i64: 16, 32>}, {pipeline_mode = #tpu.pipeline_mode<synchronous>, transform_indices = @transform_1, window_bounds = array<i64: 32, 64>}, {pipeline_mode = #tpu.pipeline_mode<synchronous>, transform_indices = @transform_2, window_bounds = array<i64: 1, 64>}, {pipeline_mode = #tpu.pipeline_mode<synchronous>, transform_indices = @transform_3, window_bounds = array<i64: 64, 32>}, {pipeline_mode = #tpu.pipeline_mode<synchronous>, transform_indices = @transform_4, window_bounds = array<i64: 1, 32>}, {transform_indices = @transform_5, window_bounds = array<i64: 16, 32>}]} {
    %c0 = arith.constant 0 : index
    %c0_0 = arith.constant 0 : index
    %0 = vector.load %arg1[%c0, %c0_0] : memref<16x32xbf16, #tpu.memory_space<vmem>>, vector<16x32xbf16>
    %c0_1 = arith.constant 0 : index
    %c0_2 = arith.constant 0 : index
    %1 = vector.load %arg2[%c0_1, %c0_2] : memref<32x64xbf16, #tpu.memory_space<vmem>>, vector<32x64xbf16>
    %cst = arith.constant dense<0.000000e+00> : vector<16x64xf32>
    %2 = tpu.matmul %0, %1, %cst {dimension_numbers = #tpu.dot_dimension_numbers<[1], [0], [0], [1], [0, 0, 1, 1], [], []>} : vector<16x32xbf16>, vector<32x64xbf16>, vector<16x64xf32> -> vector<16x64xf32>
    %c0_3 = arith.constant 0 : index
    %c0_4 = arith.constant 0 : index
    %3 = vector.load %arg3[%c0_3, %c0_4] : memref<1x64xf32, #tpu.memory_space<vmem>>, vector<1x64xf32>
    %4 = vector.broadcast %3 : vector<1x64xf32> to vector<16x64xf32>
    %5 = arith.addf %2, %4 : vector<16x64xf32>
    %cst_5 = arith.constant 0.000000e+00 : f32
    %6 = vector.broadcast %cst_5 : f32 to vector<16x64xf32>
    %7 = arith.maximumf %5, %6 : vector<16x64xf32>
    %8 = arith.truncf %7 : vector<16x64xf32> to vector<16x64xbf16>
    %c0_6 = arith.constant 0 : index
    %c0_7 = arith.constant 0 : index
    %9 = vector.load %arg4[%c0_6, %c0_7] : memref<64x32xbf16, #tpu.memory_space<vmem>>, vector<64x32xbf16>
    %cst_8 = arith.constant dense<0.000000e+00> : vector<16x32xf32>
    %10 = tpu.matmul %8, %9, %cst_8 {dimension_numbers = #tpu.dot_dimension_numbers<[1], [0], [0], [1], [0, 0, 1, 1], [], []>} : vector<16x64xbf16>, vector<64x32xbf16>, vector<16x32xf32> -> vector<16x32xf32>
    %c0_9 = arith.constant 0 : index
    %c0_10 = arith.constant 0 : index
    %11 = vector.load %arg5[%c0_9, %c0_10] : memref<1x32xf32, #tpu.memory_space<vmem>>, vector<1x32xf32>
    %12 = vector.broadcast %11 : vector<1x32xf32> to vector<16x32xf32>
    %13 = arith.addf %10, %12 : vector<16x32xf32>
    %14 = arith.truncf %13 : vector<16x32xf32> to vector<16x32xbf16>
    %c0_11 = arith.constant 0 : index
    %c0_12 = arith.constant 0 : index
    %15 = vector.load %arg6[%c0_11, %c0_12] : memref<16x32xbf16, #tpu.memory_space<vmem>>, vector<16x32xbf16>
    tpu.vector_store %arg6[%c0_11, %c0_12], %14 {strides = array<i32>} : memref<16x32xbf16, #tpu.memory_space<vmem>>, vector<16x32xbf16>,
    return
  }
  func.func @transform_0(%arg0: i32) -> (i32, i32) {
    %c0_i32 = arith.constant 0 : i32
    %c0_i32_0 = arith.constant 0 : i32
    return %arg0, %c0_i32 : i32, i32
  }
  func.func @transform_1(%arg0: i32) -> (i32, i32) {
    %c0_i32 = arith.constant 0 : i32
    %c0_i32_0 = arith.constant 0 : i32
    %c0_i32_1 = arith.constant 0 : i32
    return %c0_i32, %c0_i32_0 : i32, i32
  }
  func.func @transform_2(%arg0: i32) -> (i32, i32) {
    %c0_i32 = arith.constant 0 : i32
    %c0_i32_0 = arith.constant 0 : i32
    %c0_i32_1 = arith.constant 0 : i32
    return %c0_i32, %c0_i32_0 : i32, i32
  }
  func.func @transform_3(%arg0: i32) -> (i32, i32) {
    %c0_i32 = arith.constant 0 : i32
    %c0_i32_0 = arith.constant 0 : i32
    %c0_i32_1 = arith.constant 0 : i32
    return %c0_i32, %c0_i32_0 : i32, i32
  }
  func.func @transform_4(%arg0: i32) -> (i32, i32) {
    %c0_i32 = arith.constant 0 : i32
    %c0_i32_0 = arith.constant 0 : i32
    %c0_i32_1 = arith.constant 0 : i32
    return %c0_i32, %c0_i32_0 : i32, i32
  }
  func.func @transform_5(%arg0: i32) -> (i32, i32) {
    %c0_i32 = arith.constant 0 : i32
    %c0_i32_0 = arith.constant 0 : i32
    return %arg0, %c0_i32 : i32, i32
  }
}

module attributes {stable_mosaic.version = 11 : i64} {
  func.func @_self_attn_kernel(%arg0: i32, %arg1: memref<1x8x96xbf16, #tpu.memory_space<vmem>>, %arg2: memref<1x1x8xf32, #tpu.memory_space<vmem>>, %arg3: memref<1x8x32xbf16, #tpu.memory_space<vmem>>) attributes {dimension_semantics = [#tpu.dimension_semantics<parallel>], iteration_bounds = array<i64: 2>, scalar_prefetch = 0 : i64, scratch_operands = 0 : i64, tpu.core_type = #tpu.core_type<tc>, window_params = [{transform_indices = @transform_0, window_bounds = array<i64: 1, 8, 96>}, {transform_indices = @transform_1, window_bounds = array<i64: 1, 1, 8>}, {transform_indices = @transform_2, window_bounds = array<i64: 1, 8, 32>}]} {
    %c0 = arith.constant 0 : index
    %c0_0 = arith.constant 0 : index
    %c0_1 = arith.constant 0 : index
    %0 = vector.load %arg1[%c0, %c0_0, %c0_1] : memref<1x8x96xbf16, #tpu.memory_space<vmem>>, vector<1x8x96xbf16>
    %1 = vector.shape_cast %0 : vector<1x8x96xbf16> to vector<8x96xbf16>
    %2 = vector.extract_strided_slice %1 {offsets = [0, 0], sizes = [8, 32], strides = [1, 1]} : vector<8x96xbf16> to vector<8x32xbf16>
    %3 = vector.extract_strided_slice %1 {offsets = [0, 32], sizes = [8, 32], strides = [1, 1]} : vector<8x96xbf16> to vector<8x32xbf16>
    %4 = vector.extract_strided_slice %1 {offsets = [0, 64], sizes = [8, 32], strides = [1, 1]} : vector<8x96xbf16> to vector<8x32xbf16>
    %c0_2 = arith.constant 0 : index
    %c0_3 = arith.constant 0 : index
    %c0_4 = arith.constant 0 : index
    %5 = vector.load %arg2[%c0_2, %c0_3, %c0_4] : memref<1x1x8xf32, #tpu.memory_space<vmem>>, vector<1x1x8xf32>
    %6 = vector.shape_cast %5 : vector<1x1x8xf32> to vector<1x8xf32>
    %7 = tpu.iota {dimensions = array<i32: 0>} : vector<8x8xi32>
    %8 = tpu.iota {dimensions = array<i32: 1>} : vector<8x8xi32>
    %9 = arith.cmpi sgt, %8, %7 : vector<8x8xi32>
    %10 = vector.extract_strided_slice %2 {offsets = [0, 0], sizes = [8, 16], strides = [1, 1]} : vector<8x32xbf16> to vector<8x16xbf16>
    %11 = vector.extract_strided_slice %3 {offsets = [0, 0], sizes = [8, 16], strides = [1, 1]} : vector<8x32xbf16> to vector<8x16xbf16>
    %cst = arith.constant dense<0.000000e+00> : vector<8x8xf32>
    %12 = tpu.matmul %10, %11, %cst {dimension_numbers = #tpu.dot_dimension_numbers<[1], [1], [0], [0], [0, 0, 1, 0], [], []>} : vector<8x16xbf16>, vector<8x16xbf16>, vector<8x8xf32> -> vector<8x8xf32>
    %cst_5 = arith.constant 2.500000e-01 : f32
    %13 = vector.broadcast %cst_5 : f32 to vector<8x8xf32>
    %14 = arith.mulf %12, %13 : vector<8x8xf32>
    %15 = vector.broadcast %6 : vector<1x8xf32> to vector<8x8xf32>
    %16 = arith.addf %14, %15 : vector<8x8xf32>
    %cst_6 = arith.constant -1.000000e+09 : f32
    %17 = vector.broadcast %cst_6 : f32 to vector<8x8xf32>
    %18 = arith.select %9, %17, %16 : vector<8x8xi1>, vector<8x8xf32>
    %cst_7 = arith.constant dense<0xFF800000> : vector<8xf32>
    %19 = vector.multi_reduction <maximumf>, %18, %cst_7 [1] : vector<8x8xf32> to vector<8xf32>
    %20 = vector.shape_cast %19 : vector<8xf32> to vector<8x1xf32>
    %21 = vector.broadcast %20 : vector<8x1xf32> to vector<8x8xf32>
    %22 = arith.subf %18, %21 : vector<8x8xf32>
    %23 = math.exp %22 : vector<8x8xf32>
    %cst_8 = arith.constant dense<0.000000e+00> : vector<8xf32>
    %24 = vector.multi_reduction <add>, %23, %cst_8 [1] : vector<8x8xf32> to vector<8xf32>
    %25 = vector.shape_cast %24 : vector<8xf32> to vector<8x1xf32>
    %26 = tpu.reciprocal %25 {approx = true} : vector<8x1xf32> -> vector<8x1xf32>
    %27 = vector.broadcast %26 : vector<8x1xf32> to vector<8x8xf32>
    %28 = arith.mulf %23, %27 : vector<8x8xf32>
    %29 = arith.truncf %28 : vector<8x8xf32> to vector<8x8xbf16>
    %30 = vector.extract_strided_slice %4 {offsets = [0, 0], sizes = [8, 16], strides = [1, 1]} : vector<8x32xbf16> to vector<8x16xbf16>
    %cst_9 = arith.constant dense<0.000000e+00> : vector<8x16xf32>
    %31 = tpu.matmul %29, %30, %cst_9 {dimension_numbers = #tpu.dot_dimension_numbers<[1], [0], [0], [1], [0, 0, 1, 1], [], []>} : vector<8x8xbf16>, vector<8x16xbf16>, vector<8x16xf32> -> vector<8x16xf32>
    %32 = vector.extract_strided_slice %2 {offsets = [0, 16], sizes = [8, 16], strides = [1, 1]} : vector<8x32xbf16> to vector<8x16xbf16>
    %33 = vector.extract_strided_slice %3 {offsets = [0, 16], sizes = [8, 16], strides = [1, 1]} : vector<8x32xbf16> to vector<8x16xbf16>
    %cst_10 = arith.constant dense<0.000000e+00> : vector<8x8xf32>
    %34 = tpu.matmul %32, %33, %cst_10 {dimension_numbers = #tpu.dot_dimension_numbers<[1], [1], [0], [0], [0, 0, 1, 0], [], []>} : vector<8x16xbf16>, vector<8x16xbf16>, vector<8x8xf32> -> vector<8x8xf32>
    %cst_11 = arith.constant 2.500000e-01 : f32
    %35 = vector.broadcast %cst_11 : f32 to vector<8x8xf32>
    %36 = arith.mulf %34, %35 : vector<8x8xf32>
    %37 = vector.broadcast %6 : vector<1x8xf32> to vector<8x8xf32>
    %38 = arith.addf %36, %37 : vector<8x8xf32>
    %cst_12 = arith.constant -1.000000e+09 : f32
    %39 = vector.broadcast %cst_12 : f32 to vector<8x8xf32>
    %40 = arith.select %9, %39, %38 : vector<8x8xi1>, vector<8x8xf32>
    %cst_13 = arith.constant dense<0xFF800000> : vector<8xf32>
    %41 = vector.multi_reduction <maximumf>, %40, %cst_13 [1] : vector<8x8xf32> to vector<8xf32>
    %42 = vector.shape_cast %41 : vector<8xf32> to vector<8x1xf32>
    %43 = vector.broadcast %42 : vector<8x1xf32> to vector<8x8xf32>
    %44 = arith.subf %40, %43 : vector<8x8xf32>
    %45 = math.exp %44 : vector<8x8xf32>
    %cst_14 = arith.constant dense<0.000000e+00> : vector<8xf32>
    %46 = vector.multi_reduction <add>, %45, %cst_14 [1] : vector<8x8xf32> to vector<8xf32>
    %47 = vector.shape_cast %46 : vector<8xf32> to vector<8x1xf32>
    %48 = tpu.reciprocal %47 {approx = true} : vector<8x1xf32> -> vector<8x1xf32>
    %49 = vector.broadcast %48 : vector<8x1xf32> to vector<8x8xf32>
    %50 = arith.mulf %45, %49 : vector<8x8xf32>
    %51 = arith.truncf %50 : vector<8x8xf32> to vector<8x8xbf16>
    %52 = vector.extract_strided_slice %4 {offsets = [0, 16], sizes = [8, 16], strides = [1, 1]} : vector<8x32xbf16> to vector<8x16xbf16>
    %cst_15 = arith.constant dense<0.000000e+00> : vector<8x16xf32>
    %53 = tpu.matmul %51, %52, %cst_15 {dimension_numbers = #tpu.dot_dimension_numbers<[1], [0], [0], [1], [0, 0, 1, 1], [], []>} : vector<8x8xbf16>, vector<8x16xbf16>, vector<8x16xf32> -> vector<8x16xf32>
    %54 = tpu.concatenate %31, %53 in 1 : vector<8x16xf32>, vector<8x16xf32> -> vector<8x32xf32>
    %55 = arith.truncf %54 : vector<8x32xf32> to vector<8x32xbf16>
    %c0_16 = arith.constant 0 : index
    %c0_17 = arith.constant 0 : index
    %c0_18 = arith.constant 0 : index
    %56 = vector.load %arg3[%c0_16, %c0_17, %c0_18] : memref<1x8x32xbf16, #tpu.memory_space<vmem>>, vector<1x8x32xbf16>
    %57 = vector.shape_cast %56 : vector<1x8x32xbf16> to vector<8x32xbf16>
    %58 = vector.shape_cast %55 : vector<8x32xbf16> to vector<1x8x32xbf16>
    tpu.vector_store %arg3[%c0_16, %c0_17, %c0_18], %58 {strides = array<i32>} : memref<1x8x32xbf16, #tpu.memory_space<vmem>>, vector<1x8x32xbf16>,
    return
  }
  func.func @transform_0(%arg0: i32) -> (i32, i32, i32) {
    %c0_i32 = arith.constant 0 : i32
    %c0_i32_0 = arith.constant 0 : i32
    %c0_i32_1 = arith.constant 0 : i32
    return %arg0, %c0_i32, %c0_i32_0 : i32, i32, i32
  }
  func.func @transform_1(%arg0: i32) -> (i32, i32, i32) {
    %c0_i32 = arith.constant 0 : i32
    %c0_i32_0 = arith.constant 0 : i32
    %c0_i32_1 = arith.constant 0 : i32
    return %arg0, %c0_i32, %c0_i32_0 : i32, i32, i32
  }
  func.func @transform_2(%arg0: i32) -> (i32, i32, i32) {
    %c0_i32 = arith.constant 0 : i32
    %c0_i32_0 = arith.constant 0 : i32
    %c0_i32_1 = arith.constant 0 : i32
    return %arg0, %c0_i32, %c0_i32_0 : i32, i32, i32
  }
}

module attributes {stable_mosaic.version = 11 : i64} {
  func.func @_matmul_kernel(%arg0: i32, %arg1: i32, %arg2: i32, %arg3: memref<16x32xbf16, #tpu.memory_space<vmem>>, %arg4: memref<32x64xbf16, #tpu.memory_space<vmem>>, %arg5: memref<1x64xf32, #tpu.memory_space<vmem>>, %arg6: memref<16x64xbf16, #tpu.memory_space<vmem>>, %arg7: memref<16x64xf32, #tpu.memory_space<vmem>>) attributes {dimension_semantics = [#tpu.dimension_semantics<parallel>, #tpu.dimension_semantics<parallel>, #tpu.dimension_semantics<arbitrary>], iteration_bounds = array<i64: 1, 1, 1>, scalar_prefetch = 0 : i64, scratch_operands = 1 : i64, tpu.core_type = #tpu.core_type<tc>, window_params = [{transform_indices = @transform_0, window_bounds = array<i64: 16, 32>}, {transform_indices = @transform_1, window_bounds = array<i64: 32, 64>}, {transform_indices = @transform_2, window_bounds = array<i64: 1, 64>}, {transform_indices = @transform_3, window_bounds = array<i64: 16, 64>}]} {
    %c0_i32 = arith.constant 0 : i32
    %0 = arith.cmpi eq, %arg2, %c0_i32 : i32
    %1 = arith.extui %0 : i1 to i32
    %c0_i32_0 = arith.constant 0 : i32
    %2 = arith.cmpi ne, %1, %c0_i32_0 : i32
    scf.if %2 {
      %cst_10 = arith.constant 0.000000e+00 : f32
      %12 = vector.broadcast %cst_10 : f32 to vector<16x64xf32>
      %c0_11 = arith.constant 0 : index
      %c0_12 = arith.constant 0 : index
      %13 = vector.load %arg7[%c0_11, %c0_12] : memref<16x64xf32, #tpu.memory_space<vmem>>, vector<16x64xf32>
      tpu.vector_store %arg7[%c0_11, %c0_12], %12 {strides = array<i32>} : memref<16x64xf32, #tpu.memory_space<vmem>>, vector<16x64xf32>,
    } else {
    }
    %c0 = arith.constant 0 : index
    %c0_1 = arith.constant 0 : index
    %3 = vector.load %arg7[%c0, %c0_1] : memref<16x64xf32, #tpu.memory_space<vmem>>, vector<16x64xf32>
    %c0_2 = arith.constant 0 : index
    %c0_3 = arith.constant 0 : index
    %4 = vector.load %arg3[%c0_2, %c0_3] : memref<16x32xbf16, #tpu.memory_space<vmem>>, vector<16x32xbf16>
    %c0_4 = arith.constant 0 : index
    %c0_5 = arith.constant 0 : index
    %5 = vector.load %arg4[%c0_4, %c0_5] : memref<32x64xbf16, #tpu.memory_space<vmem>>, vector<32x64xbf16>
    %cst = arith.constant dense<0.000000e+00> : vector<16x64xf32>
    %6 = tpu.matmul %4, %5, %cst {dimension_numbers = #tpu.dot_dimension_numbers<[1], [0], [0], [1], [0, 0, 1, 1], [], []>} : vector<16x32xbf16>, vector<32x64xbf16>, vector<16x64xf32> -> vector<16x64xf32>
    %7 = arith.addf %3, %6 : vector<16x64xf32>
    %c0_6 = arith.constant 0 : index
    %c0_7 = arith.constant 0 : index
    %8 = vector.load %arg7[%c0_6, %c0_7] : memref<16x64xf32, #tpu.memory_space<vmem>>, vector<16x64xf32>
    tpu.vector_store %arg7[%c0_6, %c0_7], %7 {strides = array<i32>} : memref<16x64xf32, #tpu.memory_space<vmem>>, vector<16x64xf32>,
    %c0_i32_8 = arith.constant 0 : i32
    %9 = arith.cmpi eq, %arg2, %c0_i32_8 : i32
    %10 = arith.extui %9 : i1 to i32
    %c0_i32_9 = arith.constant 0 : i32
    %11 = arith.cmpi ne, %10, %c0_i32_9 : i32
    scf.if %11 {
      %c0_10 = arith.constant 0 : index
      %c0_11 = arith.constant 0 : index
      %12 = vector.load %arg7[%c0_10, %c0_11] : memref<16x64xf32, #tpu.memory_space<vmem>>, vector<16x64xf32>
      %c0_12 = arith.constant 0 : index
      %c0_13 = arith.constant 0 : index
      %13 = vector.load %arg5[%c0_12, %c0_13] : memref<1x64xf32, #tpu.memory_space<vmem>>, vector<1x64xf32>
      %14 = vector.broadcast %13 : vector<1x64xf32> to vector<16x64xf32>
      %15 = arith.addf %12, %14 : vector<16x64xf32>
      %16 = arith.truncf %15 : vector<16x64xf32> to vector<16x64xbf16>
      %c0_14 = arith.constant 0 : index
      %c0_15 = arith.constant 0 : index
      %17 = vector.load %arg6[%c0_14, %c0_15] : memref<16x64xbf16, #tpu.memory_space<vmem>>, vector<16x64xbf16>
      tpu.vector_store %arg6[%c0_14, %c0_15], %16 {strides = array<i32>} : memref<16x64xbf16, #tpu.memory_space<vmem>>, vector<16x64xbf16>,
    } else {
    }
    return
  }
  func.func @transform_0(%arg0: i32, %arg1: i32, %arg2: i32) -> (i32, i32) {
    %c0_i32 = arith.constant 0 : i32
    return %arg0, %arg2 : i32, i32
  }
  func.func @transform_1(%arg0: i32, %arg1: i32, %arg2: i32) -> (i32, i32) {
    %c0_i32 = arith.constant 0 : i32
    return %arg2, %arg1 : i32, i32
  }
  func.func @transform_2(%arg0: i32, %arg1: i32, %arg2: i32) -> (i32, i32) {
    %c0_i32 = arith.constant 0 : i32
    %c0_i32_0 = arith.constant 0 : i32
    return %c0_i32, %arg1 : i32, i32
  }
  func.func @transform_3(%arg0: i32, %arg1: i32, %arg2: i32) -> (i32, i32) {
    %c0_i32 = arith.constant 0 : i32
    return %arg0, %arg1 : i32, i32
  }
}

module attributes {stable_mosaic.version = 11 : i64} {
  func.func @_cross_attn_kernel(%arg0: i32, %arg1: memref<1x8x32xbf16, #tpu.memory_space<vmem>>, %arg2: memref<1x8x64xbf16, #tpu.memory_space<vmem>>, %arg3: memref<1x1x8xf32, #tpu.memory_space<vmem>>, %arg4: memref<1x8x32xbf16, #tpu.memory_space<vmem>>) attributes {dimension_semantics = [#tpu.dimension_semantics<parallel>], iteration_bounds = array<i64: 2>, scalar_prefetch = 0 : i64, scratch_operands = 0 : i64, tpu.core_type = #tpu.core_type<tc>, window_params = [{transform_indices = @transform_0, window_bounds = array<i64: 1, 8, 32>}, {transform_indices = @transform_1, window_bounds = array<i64: 1, 8, 64>}, {transform_indices = @transform_2, window_bounds = array<i64: 1, 1, 8>}, {transform_indices = @transform_3, window_bounds = array<i64: 1, 8, 32>}]} {
    %c0 = arith.constant 0 : index
    %c0_0 = arith.constant 0 : index
    %c0_1 = arith.constant 0 : index
    %0 = vector.load %arg1[%c0, %c0_0, %c0_1] : memref<1x8x32xbf16, #tpu.memory_space<vmem>>, vector<1x8x32xbf16>
    %1 = vector.shape_cast %0 : vector<1x8x32xbf16> to vector<8x32xbf16>
    %c0_2 = arith.constant 0 : index
    %c0_3 = arith.constant 0 : index
    %c0_4 = arith.constant 0 : index
    %2 = vector.load %arg2[%c0_2, %c0_3, %c0_4] : memref<1x8x64xbf16, #tpu.memory_space<vmem>>, vector<1x8x64xbf16>
    %3 = vector.shape_cast %2 : vector<1x8x64xbf16> to vector<8x64xbf16>
    %4 = vector.extract_strided_slice %3 {offsets = [0, 0], sizes = [8, 32], strides = [1, 1]} : vector<8x64xbf16> to vector<8x32xbf16>
    %5 = vector.extract_strided_slice %3 {offsets = [0, 32], sizes = [8, 32], strides = [1, 1]} : vector<8x64xbf16> to vector<8x32xbf16>
    %c0_5 = arith.constant 0 : index
    %c0_6 = arith.constant 0 : index
    %c0_7 = arith.constant 0 : index
    %6 = vector.load %arg3[%c0_5, %c0_6, %c0_7] : memref<1x1x8xf32, #tpu.memory_space<vmem>>, vector<1x1x8xf32>
    %7 = vector.shape_cast %6 : vector<1x1x8xf32> to vector<1x8xf32>
    %8 = vector.extract_strided_slice %1 {offsets = [0, 0], sizes = [8, 16], strides = [1, 1]} : vector<8x32xbf16> to vector<8x16xbf16>
    %9 = vector.extract_strided_slice %4 {offsets = [0, 0], sizes = [8, 16], strides = [1, 1]} : vector<8x32xbf16> to vector<8x16xbf16>
    %cst = arith.constant dense<0.000000e+00> : vector<8x8xf32>
    %10 = tpu.matmul %8, %9, %cst {dimension_numbers = #tpu.dot_dimension_numbers<[1], [1], [0], [0], [0, 0, 1, 0], [], []>} : vector<8x16xbf16>, vector<8x16xbf16>, vector<8x8xf32> -> vector<8x8xf32>
    %cst_8 = arith.constant 2.500000e-01 : f32
    %11 = vector.broadcast %cst_8 : f32 to vector<8x8xf32>
    %12 = arith.mulf %10, %11 : vector<8x8xf32>
    %13 = vector.broadcast %7 : vector<1x8xf32> to vector<8x8xf32>
    %14 = arith.addf %12, %13 : vector<8x8xf32>
    %cst_9 = arith.constant dense<0xFF800000> : vector<8xf32>
    %15 = vector.multi_reduction <maximumf>, %14, %cst_9 [1] : vector<8x8xf32> to vector<8xf32>
    %16 = vector.shape_cast %15 : vector<8xf32> to vector<8x1xf32>
    %17 = vector.broadcast %16 : vector<8x1xf32> to vector<8x8xf32>
    %18 = arith.subf %14, %17 : vector<8x8xf32>
    %19 = math.exp %18 : vector<8x8xf32>
    %cst_10 = arith.constant dense<0.000000e+00> : vector<8xf32>
    %20 = vector.multi_reduction <add>, %19, %cst_10 [1] : vector<8x8xf32> to vector<8xf32>
    %21 = vector.shape_cast %20 : vector<8xf32> to vector<8x1xf32>
    %22 = tpu.reciprocal %21 {approx = true} : vector<8x1xf32> -> vector<8x1xf32>
    %23 = vector.broadcast %22 : vector<8x1xf32> to vector<8x8xf32>
    %24 = arith.mulf %19, %23 : vector<8x8xf32>
    %25 = arith.truncf %24 : vector<8x8xf32> to vector<8x8xbf16>
    %26 = vector.extract_strided_slice %5 {offsets = [0, 0], sizes = [8, 16], strides = [1, 1]} : vector<8x32xbf16> to vector<8x16xbf16>
    %cst_11 = arith.constant dense<0.000000e+00> : vector<8x16xf32>
    %27 = tpu.matmul %25, %26, %cst_11 {dimension_numbers = #tpu.dot_dimension_numbers<[1], [0], [0], [1], [0, 0, 1, 1], [], []>} : vector<8x8xbf16>, vector<8x16xbf16>, vector<8x16xf32> -> vector<8x16xf32>
    %28 = vector.extract_strided_slice %1 {offsets = [0, 16], sizes = [8, 16], strides = [1, 1]} : vector<8x32xbf16> to vector<8x16xbf16>
    %29 = vector.extract_strided_slice %4 {offsets = [0, 16], sizes = [8, 16], strides = [1, 1]} : vector<8x32xbf16> to vector<8x16xbf16>
    %cst_12 = arith.constant dense<0.000000e+00> : vector<8x8xf32>
    %30 = tpu.matmul %28, %29, %cst_12 {dimension_numbers = #tpu.dot_dimension_numbers<[1], [1], [0], [0], [0, 0, 1, 0], [], []>} : vector<8x16xbf16>, vector<8x16xbf16>, vector<8x8xf32> -> vector<8x8xf32>
    %cst_13 = arith.constant 2.500000e-01 : f32
    %31 = vector.broadcast %cst_13 : f32 to vector<8x8xf32>
    %32 = arith.mulf %30, %31 : vector<8x8xf32>
    %33 = vector.broadcast %7 : vector<1x8xf32> to vector<8x8xf32>
    %34 = arith.addf %32, %33 : vector<8x8xf32>
    %cst_14 = arith.constant dense<0xFF800000> : vector<8xf32>
    %35 = vector.multi_reduction <maximumf>, %34, %cst_14 [1] : vector<8x8xf32> to vector<8xf32>
    %36 = vector.shape_cast %35 : vector<8xf32> to vector<8x1xf32>
    %37 = vector.broadcast %36 : vector<8x1xf32> to vector<8x8xf32>
    %38 = arith.subf %34, %37 : vector<8x8xf32>
    %39 = math.exp %38 : vector<8x8xf32>
    %cst_15 = arith.constant dense<0.000000e+00> : vector<8xf32>
    %40 = vector.multi_reduction <add>, %39, %cst_15 [1] : vector<8x8xf32> to vector<8xf32>
    %41 = vector.shape_cast %40 : vector<8xf32> to vector<8x1xf32>
    %42 = tpu.reciprocal %41 {approx = true} : vector<8x1xf32> -> vector<8x1xf32>
    %43 = vector.broadcast %42 : vector<8x1xf32> to vector<8x8xf32>
    %44 = arith.mulf %39, %43 : vector<8x8xf32>
    %45 = arith.truncf %44 : vector<8x8xf32> to vector<8x8xbf16>
    %46 = vector.extract_strided_slice %5 {offsets = [0, 16], sizes = [8, 16], strides = [1, 1]} : vector<8x32xbf16> to vector<8x16xbf16>
    %cst_16 = arith.constant dense<0.000000e+00> : vector<8x16xf32>
    %47 = tpu.matmul %45, %46, %cst_16 {dimension_numbers = #tpu.dot_dimension_numbers<[1], [0], [0], [1], [0, 0, 1, 1], [], []>} : vector<8x8xbf16>, vector<8x16xbf16>, vector<8x16xf32> -> vector<8x16xf32>
    %48 = tpu.concatenate %27, %47 in 1 : vector<8x16xf32>, vector<8x16xf32> -> vector<8x32xf32>
    %49 = arith.truncf %48 : vector<8x32xf32> to vector<8x32xbf16>
    %c0_17 = arith.constant 0 : index
    %c0_18 = arith.constant 0 : index
    %c0_19 = arith.constant 0 : index
    %50 = vector.load %arg4[%c0_17, %c0_18, %c0_19] : memref<1x8x32xbf16, #tpu.memory_space<vmem>>, vector<1x8x32xbf16>
    %51 = vector.shape_cast %50 : vector<1x8x32xbf16> to vector<8x32xbf16>
    %52 = vector.shape_cast %49 : vector<8x32xbf16> to vector<1x8x32xbf16>
    tpu.vector_store %arg4[%c0_17, %c0_18, %c0_19], %52 {strides = array<i32>} : memref<1x8x32xbf16, #tpu.memory_space<vmem>>, vector<1x8x32xbf16>,
    return
  }
  func.func @transform_0(%arg0: i32) -> (i32, i32, i32) {
    %c0_i32 = arith.constant 0 : i32
    %c0_i32_0 = arith.constant 0 : i32
    %c0_i32_1 = arith.constant 0 : i32
    return %arg0, %c0_i32, %c0_i32_0 : i32, i32, i32
  }
  func.func @transform_1(%arg0: i32) -> (i32, i32, i32) {
    %c0_i32 = arith.constant 0 : i32
    %c0_i32_0 = arith.constant 0 : i32
    %c0_i32_1 = arith.constant 0 : i32
    return %arg0, %c0_i32, %c0_i32_0 : i32, i32, i32
  }
  func.func @transform_2(%arg0: i32) -> (i32, i32, i32) {
    %c0_i32 = arith.constant 0 : i32
    %c0_i32_0 = arith.constant 0 : i32
    %c0_i32_1 = arith.constant 0 : i32
    return %arg0, %c0_i32, %c0_i32_0 : i32, i32, i32
  }
  func.func @transform_3(%arg0: i32) -> (i32, i32, i32) {
    %c0_i32 = arith.constant 0 : i32
    %c0_i32_0 = arith.constant 0 : i32
    %c0_i32_1 = arith.constant 0 : i32
    return %arg0, %c0_i32, %c0_i32_0 : i32, i32, i32
  }
}

module attributes {stable_mosaic.version = 11 : i64} {
  func.func @_matmul_kernel(%arg0: i32, %arg1: i32, %arg2: i32, %arg3: memref<16x32xbf16, #tpu.memory_space<vmem>>, %arg4: memref<32x64xbf16, #tpu.memory_space<vmem>>, %arg5: memref<1x64xf32, #tpu.memory_space<vmem>>, %arg6: memref<16x64xf32, #tpu.memory_space<vmem>>, %arg7: memref<16x64xf32, #tpu.memory_space<vmem>>) attributes {dimension_semantics = [#tpu.dimension_semantics<parallel>, #tpu.dimension_semantics<parallel>, #tpu.dimension_semantics<arbitrary>], iteration_bounds = array<i64: 1, 1, 1>, scalar_prefetch = 0 : i64, scratch_operands = 1 : i64, tpu.core_type = #tpu.core_type<tc>, window_params = [{transform_indices = @transform_0, window_bounds = array<i64: 16, 32>}, {transform_indices = @transform_1, window_bounds = array<i64: 32, 64>}, {transform_indices = @transform_2, window_bounds = array<i64: 1, 64>}, {transform_indices = @transform_3, window_bounds = array<i64: 16, 64>}]} {
    %c0_i32 = arith.constant 0 : i32
    %0 = arith.cmpi eq, %arg2, %c0_i32 : i32
    %1 = arith.extui %0 : i1 to i32
    %c0_i32_0 = arith.constant 0 : i32
    %2 = arith.cmpi ne, %1, %c0_i32_0 : i32
    scf.if %2 {
      %cst_10 = arith.constant 0.000000e+00 : f32
      %12 = vector.broadcast %cst_10 : f32 to vector<16x64xf32>
      %c0_11 = arith.constant 0 : index
      %c0_12 = arith.constant 0 : index
      %13 = vector.load %arg7[%c0_11, %c0_12] : memref<16x64xf32, #tpu.memory_space<vmem>>, vector<16x64xf32>
      tpu.vector_store %arg7[%c0_11, %c0_12], %12 {strides = array<i32>} : memref<16x64xf32, #tpu.memory_space<vmem>>, vector<16x64xf32>,
    } else {
    }
    %c0 = arith.constant 0 : index
    %c0_1 = arith.constant 0 : index
    %3 = vector.load %arg7[%c0, %c0_1] : memref<16x64xf32, #tpu.memory_space<vmem>>, vector<16x64xf32>
    %c0_2 = arith.constant 0 : index
    %c0_3 = arith.constant 0 : index
    %4 = vector.load %arg3[%c0_2, %c0_3] : memref<16x32xbf16, #tpu.memory_space<vmem>>, vector<16x32xbf16>
    %c0_4 = arith.constant 0 : index
    %c0_5 = arith.constant 0 : index
    %5 = vector.load %arg4[%c0_4, %c0_5] : memref<32x64xbf16, #tpu.memory_space<vmem>>, vector<32x64xbf16>
    %cst = arith.constant dense<0.000000e+00> : vector<16x64xf32>
    %6 = tpu.matmul %4, %5, %cst {dimension_numbers = #tpu.dot_dimension_numbers<[1], [0], [0], [1], [0, 0, 1, 1], [], []>} : vector<16x32xbf16>, vector<32x64xbf16>, vector<16x64xf32> -> vector<16x64xf32>
    %7 = arith.addf %3, %6 : vector<16x64xf32>
    %c0_6 = arith.constant 0 : index
    %c0_7 = arith.constant 0 : index
    %8 = vector.load %arg7[%c0_6, %c0_7] : memref<16x64xf32, #tpu.memory_space<vmem>>, vector<16x64xf32>
    tpu.vector_store %arg7[%c0_6, %c0_7], %7 {strides = array<i32>} : memref<16x64xf32, #tpu.memory_space<vmem>>, vector<16x64xf32>,
    %c0_i32_8 = arith.constant 0 : i32
    %9 = arith.cmpi eq, %arg2, %c0_i32_8 : i32
    %10 = arith.extui %9 : i1 to i32
    %c0_i32_9 = arith.constant 0 : i32
    %11 = arith.cmpi ne, %10, %c0_i32_9 : i32
    scf.if %11 {
      %c0_10 = arith.constant 0 : index
      %c0_11 = arith.constant 0 : index
      %12 = vector.load %arg7[%c0_10, %c0_11] : memref<16x64xf32, #tpu.memory_space<vmem>>, vector<16x64xf32>
      %c0_12 = arith.constant 0 : index
      %c0_13 = arith.constant 0 : index
      %13 = vector.load %arg5[%c0_12, %c0_13] : memref<1x64xf32, #tpu.memory_space<vmem>>, vector<1x64xf32>
      %14 = vector.broadcast %13 : vector<1x64xf32> to vector<16x64xf32>
      %15 = arith.addf %12, %14 : vector<16x64xf32>
      %c0_14 = arith.constant 0 : index
      %c0_15 = arith.constant 0 : index
      %16 = vector.load %arg6[%c0_14, %c0_15] : memref<16x64xf32, #tpu.memory_space<vmem>>, vector<16x64xf32>
      tpu.vector_store %arg6[%c0_14, %c0_15], %15 {strides = array<i32>} : memref<16x64xf32, #tpu.memory_space<vmem>>, vector<16x64xf32>,
    } else {
    }
    return
  }
  func.func @transform_0(%arg0: i32, %arg1: i32, %arg2: i32) -> (i32, i32) {
    %c0_i32 = arith.constant 0 : i32
    return %arg0, %arg2 : i32, i32
  }
  func.func @transform_1(%arg0: i32, %arg1: i32, %arg2: i32) -> (i32, i32) {
    %c0_i32 = arith.constant 0 : i32
    return %arg2, %arg1 : i32, i32
  }
  func.func @transform_2(%arg0: i32, %arg1: i32, %arg2: i32) -> (i32, i32) {
    %c0_i32 = arith.constant 0 : i32
    %c0_i32_0 = arith.constant 0 : i32
    return %c0_i32, %arg1 : i32, i32
  }
  func.func @transform_3(%arg0: i32, %arg1: i32, %arg2: i32) -> (i32, i32) {
    %c0_i32 = arith.constant 0 : i32
    return %arg0, %arg1 : i32, i32
  }
}

</mosaic_0001>

<bundles_post_ra>
// kernel: transformer_forward.35
= control target key start
LH: loop header
LB: loop body
LE: loop exit
PB: predicated region body
PF: predicated region fallthrough
CT: control target
= control target key end

     0   :  { %vm19_vm0 = vcmask 785408   ;;  %v108_v1 = vmov 0.0   ;;  %vm47_vm1 = vcmask 261120   ;;  %vm83_vm2 = vcmask 781312   ;;  %s151_s1 = inlined_call_operand.vmem [shape: bf16[32,96], index: 1, kind: input, shape index: {}]   ;;  %s152_s2 = inlined_call_operand.vmem [shape: f32[1,96], index: 2, kind: input, shape index: {}]   ;;  %s153_s0 = inlined_call_operand.vmem [shape: bf16[16,32], index: 0, kind: input, shape index: {}]   ;;  %s154_s3 = inlined_call_operand.vmem [shape: bf16[16,96], index: 3, kind: output, shape index: {}]  }
   0x1   :  { %v105_v0 = vld [vmem:[%s151_s1 + $0x8] sm:$0xff]  ;;  %20 = vst.msk [vmem:[#allocation2] sm:$0xff] %vm19_vm0, %v108_v1  ;;  %v104_v2 = vld [vmem:[%s151_s1] sm:$0xff] }
   0x2   :  { %21 = vst.msk [vmem:[#allocation2 + $0x8] sm:$0xff] %vm19_vm0, %v108_v1  ;;  %57 = vmatpush.bf16.msra.mxu0 %v105_v0  ;;  %v103_v3 = vld [vmem:[%s153_s0] sm:$0xff] }
   0x3   :  { %v107_v8 = vld [vmem:[%s152_s2] ss:$0 sm:$0xff] }
   0x6   :  { %58 = vmatpush.bf16.msra.mxu0 %v104_v2 }
   0x8   :  { %v22_v4 = vld [vmem:[#allocation2] sm:$0xff] }
   0x9   :  { %102 = vmatmul.msk.bf16.vlgmr.msra.gmra.mxu0 %vm47_vm1, %v103_v3  ;;  %v23_v7 = vld [vmem:[#allocation2 + $0x8] sm:$0xff] }
  0x86   :  { %v60_v5 = vpop.f32.mrf.mxu0 }
  0x87   :  { %v65_v6 = vadd.f32 %v60_v5, %v22_v4 }
  0x89   :  { %68 = vst.msk [vmem:[#allocation2] sm:$0xff] %vm19_vm0, %v65_v6 }
  0x8e   :  { %v62_v9 = vpop.f32.mrf.mxu0 }
  0x8f   :  { %v66_v10 = vadd.f32 %v62_v9, %v23_v7 }
  0x90   :  { %v73_v11 = vld [vmem:[#allocation2] sm:$0xff] }
  0x91   :  { %v79_v12 = vadd.f32 %v107_v8, %v73_v11  ;;  %69 = vst.msk [vmem:[#allocation2 + $0x8] sm:$0xff] %vm19_vm0, %v66_v10 }
  0x93   :  { %v81_v13 = vpack.c.bf16 %v79_v12, %v79_v12 }
  0x95   :  { %84 = vst.msk [vmem:[%s154_s3] sm:$0xf] %vm83_vm2, %v81_v13 }
  0x98   :  { %v74_v14 = vld [vmem:[#allocation2 + $0x8] sm:$0xff] }
  0x99   :  { %v80_v15 = vadd.f32 %v107_v8, %v74_v14 }
  0x9b   :  { %v82_v16 = vpack.c.bf16 %v80_v15, %v80_v15 }
  0x9d   :  { %85 = vst.msk [vmem:[%s154_s3 + $0x4] sm:$0xf] %vm83_vm2, %v82_v16 }

// kernel: transformer_forward.37
= control target key start
LH: loop header
LB: loop body
LE: loop exit
PB: predicated region body
PF: predicated region fallthrough
CT: control target
= control target key end

     0   :  { %vm19_vm0 = vcmask 261120   ;;  %v107_v1 = vmov 0.0   ;;  %vm82_vm1 = vcmask 257024   ;;  %s151_s1 = inlined_call_operand.vmem [shape: bf16[32,32], index: 1, kind: input, shape index: {}]   ;;  %s152_s2 = inlined_call_operand.vmem [shape: f32[1,32], index: 2, kind: input, shape index: {}]   ;;  %s153_s0 = inlined_call_operand.vmem [shape: bf16[16,32], index: 0, kind: input, shape index: {}]   ;;  %s154_s3 = inlined_call_operand.vmem [shape: bf16[16,32], index: 3, kind: output, shape index: {}]  }
   0x1   :  { %v104_v0 = vld [vmem:[%s151_s1 + $0x8] sm:$0xff]  ;;  %20 = vst.msk [vmem:[#allocation2] sm:$0xff] %vm19_vm0, %v107_v1  ;;  %v103_v2 = vld [vmem:[%s151_s1] sm:$0xff] }
   0x2   :  { %21 = vst.msk [vmem:[#allocation2 + $0x8] sm:$0xff] %vm19_vm0, %v107_v1  ;;  %57 = vmatpush.bf16.msra.mxu0 %v104_v0  ;;  %v102_v3 = vld [vmem:[%s153_s0] sm:$0xff] }
   0x3   :  { %v106_v8 = vld [vmem:[%s152_s2] ss:$0 sm:$0xff] }
   0x6   :  { %58 = vmatpush.bf16.msra.mxu0 %v103_v2 }
   0x8   :  { %v22_v4 = vld [vmem:[#allocation2] sm:$0xff] }
   0x9   :  { %101 = vmatmul.msk.bf16.vlgmr.msra.gmra.mxu0 %vm19_vm0, %v102_v3  ;;  %v23_v7 = vld [vmem:[#allocation2 + $0x8] sm:$0xff] }
  0x86   :  { %v60_v5 = vpop.f32.mrf.mxu0 }
  0x87   :  { %v65_v6 = vadd.f32 %v60_v5, %v22_v4 }
  0x89   :  { %67 = vst.msk [vmem:[#allocation2] sm:$0xff] %vm19_vm0, %v65_v6 }
  0x8e   :  { %v62_v9 = vpop.f32.mrf.mxu0 }
  0x8f   :  { %v66_v10 = vadd.f32 %v62_v9, %v23_v7 }
  0x90   :  { %v72_v11 = vld [vmem:[#allocation2] sm:$0xff] }
  0x91   :  { %v78_v12 = vadd.f32 %v106_v8, %v72_v11  ;;  %68 = vst.msk [vmem:[#allocation2 + $0x8] sm:$0xff] %vm19_vm0, %v66_v10 }
  0x93   :  { %v80_v13 = vpack.c.bf16 %v78_v12, %v78_v12 }
  0x95   :  { %83 = vst.msk [vmem:[%s154_s3] sm:$0xf] %vm82_vm1, %v80_v13 }
  0x98   :  { %v73_v14 = vld [vmem:[#allocation2 + $0x8] sm:$0xff] }
  0x99   :  { %v79_v15 = vadd.f32 %v106_v8, %v73_v14 }
  0x9b   :  { %v81_v16 = vpack.c.bf16 %v79_v15, %v79_v15 }
  0x9d   :  { %84 = vst.msk [vmem:[%s154_s3 + $0x4] sm:$0xf] %vm82_vm1, %v81_v16 }

// kernel: transformer_forward.36
= control target key start
LH: loop header
LB: loop body
LE: loop exit
PB: predicated region body
PF: predicated region fallthrough
CT: control target
= control target key end

     0   :  { %s414_s9 = smov 0   ;;  %s453_s0 = inlined_call_operand.vmem [shape: bf16[2,8,96], index: 0, kind: input, shape index: {}]   ;;  %s454_s1 = inlined_call_operand.vmem [shape: f32[2,1,8], index: 1, kind: input, shape index: {}]   ;;  %s455_s2 = inlined_call_operand.vmem [shape: bf16[2,8,32], index: 2, kind: output, shape index: {}]  }
   0x1 LB: > { %s349_s10 = sadd.s32 4294967295, %s391_s9   ;;  %p353_p0 = scmp.ge.s32.totalorder %s391_s9, 1  ;;  %s391_s9 = sphi %s414_s9, %s12_s9  }
   0x2   : > { %p119_p1 = scmp.lt.s32.totalorder %s391_s9, 3 }
   0x4   : > { %p120_p2 = pnand %p353_p0, %p119_p1 }
   0x5   : > { %p142_p3 = scmp.lt.s32.totalorder (!%p120_p2), %s349_s10, 1  ;;  %s393_s15 = smov (!%p120_p2), 96  }
   0x6   : > { %123 = sbr.rel (%p120_p2) target bundleno = 761 (0x2f9), region = 28  ;;  %s394_s16 = smov (!%p120_p2), 80  }
   0x7   : > { %s395_s17 = smov (!%p120_p2), 112   ;;  %s396_s21 = smov (!%p120_p2), 48  }
   0x8   : > { %s397_s22 = smov (!%p120_p2), 64   ;;  %s398_s23 = smov (!%p120_p2), 16  }
   0xb   : > { %s457_s10 = smov (!%p142_p3, %s349_s10), 1  ;;  %vm161_vm0 = vcmask 130048   ;;  %vm186_vm1 = vcmask 64512   ;;  %vm204_vm2 = vcmask 1043456   ;;  %vm285_vm3 = vcmask 257024  }
   0xc   : > { %s354_s11 = sshll.u32 %s457_s10, 2  ;;  %s148_s20 = scalar_lea.vmem %s454_s1, %s457_s10 }
   0xd   : > { %s145_s14 = scalar_lea.vmem %s453_s0, %s354_s11  ;;  %v376_v8 = vld [vmem:[%s148_s20] ss:$0 sm:$0xff]  ;;  %s152_s26 = scalar_lea.vmem %s455_s2, %s354_s11 }
   0xe   : > { %v154_v0 = vld [vmem:[%s145_s14] sm:$0xf] }
   0xf   : > { %v157_v1 = vunpack.c.l.b16 %v154_v0 }
  0x11   : > { %v158_v2 = vpack.c.b16 %v157_v1, %v157_v1 }
  0x13   : > { %159 = vrot.lane.b32.xlu1 %v158_v2, %s393_s15  ;;  %223 = vrot.lane.b32.xlu0 %v158_v2, %s394_s16 }
  0x1b   : > { %221 = vrot.lane.b32.xlu0 %v158_v2, %s395_s17 }
  0x23   : > { %258 = vrot.lane.b32.xlu0 %v158_v2, %s396_s21 }
  0x2b   : > { %199 = vrot.lane.b32.xlu0 %v158_v2, %s397_s22 }
  0x85   : > { %v160_v3 = vpop.permute.xlu1 %159  ;;  %v224_v4 = vpop.permute.xlu0 %223 }
  0x86   : > { %v166_v5 = vsel %vm161_vm0, %v160_v3, 0  ;;  %v229_v6 = vsel %vm161_vm0, %v224_v4, 0 }
  0x87   : > { %175 = vmatpush.bf16.xpose.msra.mxu0 %v166_v5  ;;  %238 = vmatpush.bf16.xpose.msra.mxu2 %v229_v6 }
  0x8d   : > { %v222_v7 = vpop.permute.xlu0 %221 }
  0x8e   : > { %356 = vmatmul.msk.bf16.vlgmr.msra.gmra.mxu0 %vm161_vm0, %v154_v0  ;;  %358 = vmatmul.msk.bf16.vlgmr.msra.gmra.mxu2 %vm161_vm0, %v222_v7 }
  0x95   : > { %v259_v29 = vpop.permute.xlu0 %258 }
  0x96   : > { %v264_v30 = vsel %vm204_vm2, %v259_v29, 0 }
  0x97   : > { %273 = vmatpush.bf16.msra.mxu3 %v264_v30 }
  0x9d   : > { %v200_v31 = vpop.permute.xlu0 %199 }
  0x9e   : > { %v206_v32 = vsel %vm204_vm2, %v200_v31, 0 }
  0x9f   : > { %215 = vmatpush.bf16.msra.mxu1 %v206_v32 }
 0x10b   : > { %v177_v9 = vpop.f32.mrf.mxu0 }
 0x10c   : > { %v181_v10 = vmul.f32 0.25, %v177_v9 }
 0x10e   : > { %v185_v11 = vadd.f32 %v376_v8, %v181_v10 }
 0x110   : > { %v187_v12 = vsel %vm186_vm1, %v185_v11, -inf }
 0x111   : > { %188 = vmax.xlane.f32.xlu2 %v187_v12  ;;  %v240_v13 = vpop.f32.mrf.mxu2 }
 0x112   : > { %v244_v14 = vmul.f32 0.25, %v240_v13 }
 0x113   : > { %v179_v15 = vpop.f32.mrf.mxu0 }
 0x114   : > { %v245_v16 = vadd.f32 %v376_v8, %v244_v14 }
 0x116   : > { %v246_v17 = vsel %vm186_vm1, %v245_v16, -inf }
 0x117   : > { %247 = vmax.xlane.f32.xlu1 %v246_v17 }
 0x119   : > { %v242_v18 = vpop.f32.mrf.mxu2 }
 0x184   : > { %v189_v19 = vpop.xlane.xlu2 %188 }
 0x185   : > { %v190_v22 = vsub.f32 %v185_v11, %v189_v19 }
 0x187   : > { %v191_v24 = vmul.f32 1.442695, %v190_v22 }
 0x18a   : > { %v248_v20 = vpop.xlane.xlu1 %247 }
 0x18b   : > { %v249_v21 = vsub.f32 %v245_v16, %v248_v20 }
 0x18d   : > { %v250_v23 = vmul.f32 1.442695, %v249_v21 }
 0x18f   : > { %377 = vpow2.f32 %v250_v23 }
 0x190   : > { %379 = vpow2.f32 %v191_v24 }
 0x195   : > { %v378_v25 = vpop.eup %377 }
 0x196   : > { %v252_v26 = vsel %vm186_vm1, %v378_v25, 0.0  ;;  %v380_v27 = vpop.eup %379 }
 0x197   : > { %253 = vadd.xlane.f32.xlu2 %v252_v26  ;;  %v193_v28 = vsel %vm186_vm1, %v380_v27, 0.0 }
 0x19f   : > { %194 = vadd.xlane.f32.xlu2 %v193_v28 }
 0x20a   : > { %v254_v33 = vpop.xlane.xlu2 %253 }
 0x20b   : > { %381 = vrcp.f32 %v254_v33 }
 0x211   : > { %v382_v34 = vpop.eup %381 }
 0x212   : > { %v195_v35 = vpop.xlane.xlu2 %194  ;;  %v256_v36 = vmul.f32 %v382_v34, %v378_v25 }
 0x213   : > { %383 = vrcp.f32 %v195_v35 }
 0x214   : > { %v257_v37 = vpack.c.bf16 %v256_v36, %v256_v36 }
 0x216   : > { %359 = vmatmul.msk.bf16.vlgmr.msra.gmra.mxu3 %vm186_vm1, %v257_v37 }
 0x219   : > { %v384_v38 = vpop.eup %383 }
 0x21a   : > { %v197_v39 = vmul.f32 %v384_v38, %v380_v27 }
 0x21c   : > { %v198_v40 = vpack.c.bf16 %v197_v39, %v197_v39 }
 0x21e   : > { %357 = vmatmul.msk.bf16.vlgmr.msra.gmra.mxu1 %vm186_vm1, %v198_v40 }
 0x299   : > { %v275_v41 = vpop.f32.mrf.mxu3 }
 0x29a   : > { %280 = vrot.lane.b32.xlu2 %v275_v41, %s398_s23 }
 0x29b   : > { %v217_v42 = vpop.f32.mrf.mxu1 }
 0x2a1   : > { %v277_v43 = vpop.f32.mrf.mxu3 }
 0x2a3   : > { %v219_v44 = vpop.f32.mrf.mxu1 }
 0x2f4   : > { %v281_v45 = vpop.permute.xlu2 %280 }
 0x2f5   : > { %v283_v46 = vsel %vm161_vm0, %v217_v42, %v281_v45 }
 0x2f6   : > { %v284_v47 = vpack.c.bf16 %v283_v46, %v283_v46 }
 0x2f8   : > { %286 = vst.msk [vmem:[%s152_s26] sm:$0xf] %vm285_vm3, %v284_v47 }
 0x2f9 PF: > { %s12_s9 = sadd.s32 1, %s391_s9  }
 0x2fa   : > { %p9_p4 = scmp.ge.s32.totalorder %s12_s9, 4  }
 0x2fc   :  { %11 = sbr.rel (!%p9_p4) target bundleno = 1 (0x1), region = 61 }

// kernel: transformer_forward.38
= control target key start
LH: loop header
LB: loop body
LE: loop exit
PB: predicated region body
PF: predicated region fallthrough
CT: control target
= control target key end

     0   :  { %vm27_vm0 = vcmask 261120   ;;  %v117_v10 = vmov 32.0   ;;  %vm93_vm6 = vcmask 257024   ;;  %s165_s0 = inlined_call_operand.vmem [shape: bf16[16,32], index: 0, kind: input, shape index: {}]   ;;  %s166_s1 = inlined_call_operand.vmem [shape: bf16[16,32], index: 1, kind: input, shape index: {}]   ;;  %s167_s2 = inlined_call_operand.vmem [shape: f32[1,32], index: 2, kind: input, shape index: {}]   ;;  %s168_s3 = inlined_call_operand.vmem [shape: f32[1,32], index: 3, kind: input, shape index: {}]   ;;  %s169_s4 = inlined_call_operand.vmem [shape: bf16[16,32], index: 4, kind: output, shape index: {}]  }
   0x1   :  { %v101_v0 = vld [vmem:[%s165_s0] sm:$0xff]   ;;  %111 = vrcp.f32 %v117_v10 }
   0x2   :  { %v105_v1 = vld [vmem:[%s166_s1] sm:$0xff]   ;;  %v102_v2 = vunpack.c.l.bf16 %v101_v0  ;;  %v103_v5 = vunpack.c.h.bf16 %v101_v0 }
   0x3   :  { %v106_v3 = vunpack.c.l.bf16 %v105_v1  ;;  %v107_v6 = vunpack.c.h.bf16 %v105_v1  ;;  %v109_v41 = vld [vmem:[%s167_s2] ss:$0 sm:$0xff] }
   0x4   :  { %v110_v44 = vld [vmem:[%s168_s3] ss:$0 sm:$0xff] }
   0x5   :  { %v25_v4 = vadd.f32 %v106_v3, %v102_v2  ;;  %v26_v8 = vadd.f32 %v107_v6, %v103_v5 }
   0x7   :  { %v28_v7 = vsel %vm27_vm0, %v25_v4, 0.0  ;;  %v31_v9 = vsel %vm27_vm0, %v26_v8, 0.0  ;;  %v112_v11 = vpop.eup %111 }
   0x8   :  { %29 = vadd.xlane.f32.xlu0 %v28_v7  ;;  %v35_v12 = vmul.f32 32.0, %v112_v11  ;;  %vm39_vm1 = vweird.f32 %v112_v11 }
   0xa   :  { %v36_v13 = vsub.f32 1.0, %v35_v12 }
   0xc   :  { %v37_v14 = vmul.f32 %v112_v11, %v36_v13 }
   0xe   :  { %v38_v15 = vadd.f32 %v112_v11, %v37_v14 }
  0x10   :  { %32 = vadd.xlane.f32.xlu0 %v31_v9  ;;  %v40_v16 = vsel %vm39_vm1, %v112_v11, %v38_v15 }
  0x7b   :  { %v30_v17 = vpop.xlane.xlu0 %29 }
  0x7c   :  { %v41_v18 = vmul.f32 %v40_v16, %v30_v17 }
  0x7e   :  { %v43_v19 = vsub.f32 %v25_v4, %v41_v18 }
  0x80   :  { %v45_v20 = vmul.f32 %v43_v19, %v43_v19 }
  0x82   :  { %v47_v21 = vsel %vm27_vm0, %v45_v20, 0.0 }
  0x83   :  { %48 = vadd.xlane.f32.xlu1 %v47_v21  ;;  %v33_v22 = vpop.xlane.xlu0 %32 }
  0x84   :  { %v42_v23 = vmul.f32 %v40_v16, %v33_v22 }
  0x86   :  { %v44_v24 = vsub.f32 %v26_v8, %v42_v23 }
  0x88   :  { %v46_v25 = vmul.f32 %v44_v24, %v44_v24 }
  0x8a   :  { %v50_v26 = vsel %vm27_vm0, %v46_v25, 0.0 }
  0x8b   :  { %51 = vadd.xlane.f32.xlu1 %v50_v26 }
  0xf6   :  { %v49_v27 = vpop.xlane.xlu1 %48 }
  0xf7   :  { %v53_v28 = vmul.f32 %v49_v27, %v40_v16 }
  0xf9   :  { %v55_v29 = vadd.f32 1e-05, %v53_v28 }
  0xfb   :  { %113 = vrsqrt.f32 %v55_v29  ;;  %vm63_vm3 = vweird.f32 %v55_v29 }
  0xfe   :  { %v52_v30 = vpop.xlane.xlu1 %51 }
  0xff   :  { %v54_v31 = vmul.f32 %v52_v30, %v40_v16 }
 0x101   :  { %v114_v32 = vpop.eup %113  ;;  %v56_v33 = vadd.f32 1e-05, %v54_v31 }
 0x102   :  { %v58_v34 = vmul.f32 %v114_v32, %v55_v29  ;;  %vm64_vm2 = vweird.f32 %v114_v32 }
 0x103   :  { %115 = vrsqrt.f32 %v56_v33  ;;  %vm65_vm4 = vmor %vm63_vm3, %vm64_vm2  ;;  %vm73_vm7 = vweird.f32 %v56_v33 }
 0x104   :  { %v59_v35 = vmul.f32 %v114_v32, %v58_v34 }
 0x106   :  { %v60_v36 = vmul.f32 0.5, %v59_v35 }
 0x108   :  { %v61_v37 = vsub.f32 1.5, %v60_v36 }
 0x109   :  { %v116_v38 = vpop.eup %115 }
 0x10a   :  { %v62_v39 = vmul.f32 %v114_v32, %v61_v37  ;;  %v68_v40 = vmul.f32 %v116_v38, %v56_v33  ;;  %vm74_vm5 = vweird.f32 %v116_v38 }
 0x10b   :  { %vm75_vm8 = vmor %vm73_vm7, %vm74_vm5 }
 0x10c   :  { %v66_v42 = vsel %vm65_vm4, %v114_v32, %v62_v39  ;;  %v69_v43 = vmul.f32 %v116_v38, %v68_v40 }
 0x10d   :  { %v77_v45 = vmul.f32 %v66_v42, %v43_v19 }
 0x10e   :  { %v70_v46 = vmul.f32 0.5, %v69_v43 }
 0x10f   :  { %v83_v47 = vmul.f32 %v109_v41, %v77_v45 }
 0x110   :  { %v71_v48 = vsub.f32 1.5, %v70_v46 }
 0x111   :  { %v89_v49 = vadd.f32 %v110_v44, %v83_v47 }
 0x112   :  { %v72_v50 = vmul.f32 %v116_v38, %v71_v48 }
 0x113   :  { %v91_v51 = vpack.c.bf16 %v89_v49, %v89_v49 }
 0x114   :  { %v76_v52 = vsel %vm75_vm8, %v116_v38, %v72_v50 }
 0x115   :  { %94 = vst.msk [vmem:[%s169_s4] sm:$0xf] %vm93_vm6, %v91_v51  ;;  %v78_v53 = vmul.f32 %v76_v52, %v44_v24 }
 0x117   :  { %v84_v54 = vmul.f32 %v109_v41, %v78_v53 }
 0x119   :  { %v90_v55 = vadd.f32 %v110_v44, %v84_v54 }
 0x11b   :  { %v92_v56 = vpack.c.bf16 %v90_v55, %v90_v55 }
 0x11d   :  { %95 = vst.msk [vmem:[%s169_s4 + $0x4] sm:$0xf] %vm93_vm6, %v92_v56 }

// kernel: transformer_forward.39
= control target key start
LH: loop header
LB: loop body
LE: loop exit
PB: predicated region body
PF: predicated region fallthrough
CT: control target
= control target key end

     0   :  { %vm48_vm0 = vcmask 261120   ;;  %vm105_vm1 = vcmask 523264   ;;  %vm125_vm2 = vcmask 257024   ;;  %s234_s1 = inlined_call_operand.vmem [shape: bf16[32,64], index: 1, kind: input, shape index: {}]   ;;  %s235_s2 = inlined_call_operand.vmem [shape: f32[1,64], index: 2, kind: input, shape index: {}]   ;;  %s236_s0 = inlined_call_operand.vmem [shape: bf16[16,32], index: 0, kind: input, shape index: {}]   ;;  %s237_s4 = inlined_call_operand.vmem [shape: f32[1,32], index: 4, kind: input, shape index: {}]   ;;  %s238_s3 = inlined_call_operand.vmem [shape: bf16[64,32], index: 3, kind: input, shape index: {}]   ;;  %s239_s5 = inlined_call_operand.vmem [shape: bf16[16,32], index: 5, kind: output, shape index: {}]  }
   0x1   :  { %v164_v0 = vld [vmem:[%s234_s1 + $0x8] sm:$0xff]  ;;  %v163_v1 = vld [vmem:[%s234_s1] sm:$0xff]  ;;  %v168_v3 = vld [vmem:[%s238_s3 + $0x18] sm:$0xff] }
   0x2   :  { %58 = vmatpush.bf16.msra.mxu0 %v164_v0  ;;  %v162_v2 = vld [vmem:[%s236_s0] sm:$0xff]  ;;  %113 = vmatpush.bf16.msra.mxu1 %v168_v3  ;;  %v167_v4 = vld [vmem:[%s238_s3 + $0x10] sm:$0xff]  ;;  %v166_v5 = vld [vmem:[%s238_s3 + $0x8] sm:$0xff] }
   0x3   :  { %v165_v6 = vld [vmem:[%s238_s3] sm:$0xff] }
   0x4   :  { %v169_v8 = vld [vmem:[%s235_s2] ss:$0 sm:$0xff] }
   0x5   :  { %v170_v15 = vld [vmem:[%s237_s4] ss:$0 sm:$0xff] }
   0x6   :  { %59 = vmatpush.bf16.msra.mxu0 %v163_v1  ;;  %114 = vmatpush.bf16.msra.mxu1 %v167_v4 }
   0x9   :  { %144 = vmatmul.msk.bf16.vlgmr.msra.gmra.mxu0 %vm48_vm0, %v162_v2 }
   0xa   :  { %115 = vmatpush.bf16.msra.mxu1 %v166_v5 }
   0xe   :  { %116 = vmatpush.bf16.msra.mxu1 %v165_v6 }
  0x86   :  { %v61_v7 = vpop.f32.mrf.mxu0 }
  0x87   :  { %v62_v9 = vadd.f32 %v169_v8, %v61_v7 }
  0x89   :  { %v66_v12 = vmax.f32 %v62_v9, 0.0 }
  0x8e   :  { %v63_v10 = vpop.f32.mrf.mxu0 }
  0x8f   :  { %v64_v11 = vadd.f32 %v169_v8, %v63_v10 }
  0x91   :  { %v67_v13 = vmax.f32 %v64_v11, 0.0 }
  0x93   :  { %v68_v14 = vpack.c.bf16 %v67_v13, %v66_v12 }
  0x95   :  { %161 = vmatmul.msk.bf16.vlgmr.msra.gmra.mxu1 %vm105_vm1, %v68_v14 }
 0x112   :  { %v118_v16 = vpop.f32.mrf.mxu1 }
 0x113   :  { %v119_v17 = vadd.f32 %v170_v15, %v118_v16 }
 0x115   :  { %v123_v18 = vpack.c.bf16 %v119_v17, %v119_v17 }
 0x117   :  { %126 = vst.msk [vmem:[%s239_s5] sm:$0xf] %vm125_vm2, %v123_v18 }
 0x11a   :  { %v120_v19 = vpop.f32.mrf.mxu1 }
 0x11b   :  { %v121_v20 = vadd.f32 %v170_v15, %v120_v19 }
 0x11d   :  { %v124_v21 = vpack.c.bf16 %v121_v20, %v121_v20 }
 0x11f   :  { %127 = vst.msk [vmem:[%s239_s5 + $0x4] sm:$0xf] %vm125_vm2, %v124_v21 }

// kernel: transformer_forward.48
= control target key start
LH: loop header
LB: loop body
LE: loop exit
PB: predicated region body
PF: predicated region fallthrough
CT: control target
= control target key end

     0   :  { %s421_s9 = smov 0   ;;  %s460_s0 = inlined_call_operand.vmem [shape: bf16[2,8,96], index: 0, kind: input, shape index: {}]   ;;  %s461_s1 = inlined_call_operand.vmem [shape: f32[2,1,8], index: 1, kind: input, shape index: {}]   ;;  %s462_s2 = inlined_call_operand.vmem [shape: bf16[2,8,32], index: 2, kind: output, shape index: {}]  }
   0x1 LB: > { %s356_s10 = sadd.s32 4294967295, %s398_s9   ;;  %p360_p0 = scmp.ge.s32.totalorder %s398_s9, 1  ;;  %s398_s9 = sphi %s421_s9, %s12_s9  }
   0x2   : > { %p119_p1 = scmp.lt.s32.totalorder %s398_s9, 3 }
   0x4   : > { %p120_p2 = pnand %p360_p0, %p119_p1 }
   0x5   : > { %p142_p3 = scmp.lt.s32.totalorder (!%p120_p2), %s356_s10, 1  ;;  %s400_s18 = smov (!%p120_p2), 96  }
   0x6   : > { %123 = sbr.rel (%p120_p2) target bundleno = 762 (0x2fa), region = 28  ;;  %s401_s19 = smov (!%p120_p2), 80  }
   0x7   : > { %s402_s20 = smov (!%p120_p2), 112   ;;  %s403_s21 = smov (!%p120_p2), 48  }
   0x8   : > { %s404_s22 = smov (!%p120_p2), 64   ;;  %s405_s23 = smov (!%p120_p2), 16  }
   0xb   : > { %s464_s10 = smov (!%p142_p3, %s356_s10), 1  ;;  %vm166_vm0 = vcmask 130048   ;;  %v156_v8 = vlaneseq  ;;  %vm192_vm2 = vcmask 64512   ;;  %vm210_vm3 = vcmask 1043456  }
   0xc   : > { %s361_s11 = sshll.u32 %s464_s10, 2  ;;  %s148_s17 = scalar_lea.vmem %s461_s1, %s464_s10  ;;  %vm292_vm4 = vcmask 257024  }
   0xd   : > { %s145_s14 = scalar_lea.vmem %s460_s0, %s361_s11  ;;  %v157_v9 = vshrl.u32 %v156_v8, 7  ;;  %v159_v10 = vand.u32 127, %v156_v8  ;;  %v383_v11 = vld [vmem:[%s148_s17] ss:$0 sm:$0xff]  ;;  %s152_s26 = scalar_lea.vmem %s462_s2, %s361_s11 }
   0xe   : > { %v154_v0 = vld [vmem:[%s145_s14] sm:$0xf] }
   0xf   : > { %v162_v1 = vunpack.c.l.b16 %v154_v0  ;;  %vm160_vm1 = vcmp.gt.s32.totalorder %v159_v10, %v157_v9 }
  0x11   : > { %v163_v2 = vpack.c.b16 %v162_v1, %v162_v1 }
  0x13   : > { %164 = vrot.lane.b32.xlu1 %v163_v2, %s400_s18  ;;  %229 = vrot.lane.b32.xlu0 %v163_v2, %s401_s19 }
  0x1b   : > { %227 = vrot.lane.b32.xlu0 %v163_v2, %s402_s20 }
  0x23   : > { %265 = vrot.lane.b32.xlu0 %v163_v2, %s403_s21 }
  0x2b   : > { %205 = vrot.lane.b32.xlu0 %v163_v2, %s404_s22 }
  0x85   : > { %v165_v3 = vpop.permute.xlu1 %164  ;;  %v230_v4 = vpop.permute.xlu0 %229 }
  0x86   : > { %v171_v5 = vsel %vm166_vm0, %v165_v3, 0  ;;  %v235_v6 = vsel %vm166_vm0, %v230_v4, 0 }
  0x87   : > { %180 = vmatpush.bf16.xpose.msra.mxu0 %v171_v5  ;;  %244 = vmatpush.bf16.xpose.msra.mxu2 %v235_v6 }
  0x8d   : > { %v228_v7 = vpop.permute.xlu0 %227 }
  0x8e   : > { %363 = vmatmul.msk.bf16.vlgmr.msra.gmra.mxu0 %vm166_vm0, %v154_v0  ;;  %365 = vmatmul.msk.bf16.vlgmr.msra.gmra.mxu2 %vm166_vm0, %v228_v7 }
  0x95   : > { %v266_v34 = vpop.permute.xlu0 %265 }
  0x96   : > { %v271_v35 = vsel %vm210_vm3, %v266_v34, 0 }
  0x97   : > { %280 = vmatpush.bf16.msra.mxu3 %v271_v35 }
  0x9d   : > { %v206_v36 = vpop.permute.xlu0 %205 }
  0x9e   : > { %v212_v37 = vsel %vm210_vm3, %v206_v36, 0 }
  0x9f   : > { %221 = vmatpush.bf16.msra.mxu1 %v212_v37 }
 0x10b   : > { %v182_v12 = vpop.f32.mrf.mxu0 }
 0x10c   : > { %v186_v13 = vmul.f32 0.25, %v182_v12 }
 0x10e   : > { %v190_v14 = vadd.f32 %v383_v11, %v186_v13 }
 0x110   : > { %v191_v15 = vsel %vm160_vm1, -1e+09, %v190_v14 }
 0x111   : > { %v246_v16 = vpop.f32.mrf.mxu2  ;;  %v193_v17 = vsel %vm192_vm2, %v191_v15, -inf }
 0x112   : > { %v250_v18 = vmul.f32 0.25, %v246_v16  ;;  %194 = vmax.xlane.f32.xlu2 %v193_v17 }
 0x113   : > { %v184_v19 = vpop.f32.mrf.mxu0 }
 0x114   : > { %v251_v20 = vadd.f32 %v383_v11, %v250_v18 }
 0x116   : > { %v252_v21 = vsel %vm160_vm1, -1e+09, %v251_v20 }
 0x117   : > { %v253_v22 = vsel %vm192_vm2, %v252_v21, -inf }
 0x118   : > { %254 = vmax.xlane.f32.xlu1 %v253_v22 }
 0x119   : > { %v248_v23 = vpop.f32.mrf.mxu2 }
 0x185   : > { %v195_v24 = vpop.xlane.xlu2 %194 }
 0x186   : > { %v196_v27 = vsub.f32 %v191_v15, %v195_v24 }
 0x188   : > { %v197_v29 = vmul.f32 1.442695, %v196_v27 }
 0x18b   : > { %v255_v25 = vpop.xlane.xlu1 %254 }
 0x18c   : > { %v256_v26 = vsub.f32 %v252_v21, %v255_v25 }
 0x18e   : > { %v257_v28 = vmul.f32 1.442695, %v256_v26 }
 0x190   : > { %384 = vpow2.f32 %v257_v28 }
 0x191   : > { %386 = vpow2.f32 %v197_v29 }
 0x196   : > { %v385_v30 = vpop.eup %384 }
 0x197   : > { %v259_v31 = vsel %vm192_vm2, %v385_v30, 0.0  ;;  %v387_v32 = vpop.eup %386 }
 0x198   : > { %260 = vadd.xlane.f32.xlu2 %v259_v31  ;;  %v199_v33 = vsel %vm192_vm2, %v387_v32, 0.0 }
 0x1a0   : > { %200 = vadd.xlane.f32.xlu2 %v199_v33 }
 0x20b   : > { %v261_v38 = vpop.xlane.xlu2 %260 }
 0x20c   : > { %388 = vrcp.f32 %v261_v38 }
 0x212   : > { %v389_v39 = vpop.eup %388 }
 0x213   : > { %v201_v40 = vpop.xlane.xlu2 %200  ;;  %v263_v41 = vmul.f32 %v389_v39, %v385_v30 }
 0x214   : > { %390 = vrcp.f32 %v201_v40 }
 0x215   : > { %v264_v42 = vpack.c.bf16 %v263_v41, %v263_v41 }
 0x217   : > { %366 = vmatmul.msk.bf16.vlgmr.msra.gmra.mxu3 %vm192_vm2, %v264_v42 }
 0x21a   : > { %v391_v43 = vpop.eup %390 }
 0x21b   : > { %v203_v44 = vmul.f32 %v391_v43, %v387_v32 }
 0x21d   : > { %v204_v45 = vpack.c.bf16 %v203_v44, %v203_v44 }
 0x21f   : > { %364 = vmatmul.msk.bf16.vlgmr.msra.gmra.mxu1 %vm192_vm2, %v204_v45 }
 0x29a   : > { %v282_v46 = vpop.f32.mrf.mxu3 }
 0x29b   : > { %287 = vrot.lane.b32.xlu2 %v282_v46, %s405_s23 }
 0x29c   : > { %v223_v47 = vpop.f32.mrf.mxu1 }
 0x2a2   : > { %v284_v48 = vpop.f32.mrf.mxu3 }
 0x2a4   : > { %v225_v49 = vpop.f32.mrf.mxu1 }
 0x2f5   : > { %v288_v50 = vpop.permute.xlu2 %287 }
 0x2f6   : > { %v290_v51 = vsel %vm166_vm0, %v223_v47, %v288_v50 }
 0x2f7   : > { %v291_v52 = vpack.c.bf16 %v290_v51, %v290_v51 }
 0x2f9   : > { %293 = vst.msk [vmem:[%s152_s26] sm:$0xf] %vm292_vm4, %v291_v52 }
 0x2fa PF: > { %s12_s9 = sadd.s32 1, %s398_s9  }
 0x2fb   : > { %p9_p4 = scmp.ge.s32.totalorder %s12_s9, 4  }
 0x2fd   :  { %11 = sbr.rel (!%p9_p4) target bundleno = 1 (0x1), region = 61 }

// kernel: transformer_forward.52
= control target key start
LH: loop header
LB: loop body
LE: loop exit
PB: predicated region body
PF: predicated region fallthrough
CT: control target
= control target key end

     0   :  { %vm19_vm0 = vcmask 523264   ;;  %v108_v1 = vmov 0.0   ;;  %vm47_vm1 = vcmask 261120   ;;  %vm83_vm2 = vcmask 519168   ;;  %s151_s1 = inlined_call_operand.vmem [shape: bf16[32,64], index: 1, kind: input, shape index: {}]   ;;  %s152_s2 = inlined_call_operand.vmem [shape: f32[1,64], index: 2, kind: input, shape index: {}]   ;;  %s153_s0 = inlined_call_operand.vmem [shape: bf16[16,32], index: 0, kind: input, shape index: {}]   ;;  %s154_s3 = inlined_call_operand.vmem [shape: bf16[16,64], index: 3, kind: output, shape index: {}]  }
   0x1   :  { %v105_v0 = vld [vmem:[%s151_s1 + $0x8] sm:$0xff]  ;;  %20 = vst.msk [vmem:[#allocation2] sm:$0xff] %vm19_vm0, %v108_v1  ;;  %v104_v2 = vld [vmem:[%s151_s1] sm:$0xff] }
   0x2   :  { %21 = vst.msk [vmem:[#allocation2 + $0x8] sm:$0xff] %vm19_vm0, %v108_v1  ;;  %57 = vmatpush.bf16.msra.mxu0 %v105_v0  ;;  %v103_v3 = vld [vmem:[%s153_s0] sm:$0xff] }
   0x3   :  { %v107_v8 = vld [vmem:[%s152_s2] ss:$0 sm:$0xff] }
   0x6   :  { %58 = vmatpush.bf16.msra.mxu0 %v104_v2 }
   0x8   :  { %v22_v4 = vld [vmem:[#allocation2] sm:$0xff] }
   0x9   :  { %102 = vmatmul.msk.bf16.vlgmr.msra.gmra.mxu0 %vm47_vm1, %v103_v3  ;;  %v23_v7 = vld [vmem:[#allocation2 + $0x8] sm:$0xff] }
  0x86   :  { %v60_v5 = vpop.f32.mrf.mxu0 }
  0x87   :  { %v65_v6 = vadd.f32 %v60_v5, %v22_v4 }
  0x89   :  { %68 = vst.msk [vmem:[#allocation2] sm:$0xff] %vm19_vm0, %v65_v6 }
  0x8e   :  { %v62_v9 = vpop.f32.mrf.mxu0 }
  0x8f   :  { %v66_v10 = vadd.f32 %v62_v9, %v23_v7 }
  0x90   :  { %v73_v11 = vld [vmem:[#allocation2] sm:$0xff] }
  0x91   :  { %v79_v12 = vadd.f32 %v107_v8, %v73_v11  ;;  %69 = vst.msk [vmem:[#allocation2 + $0x8] sm:$0xff] %vm19_vm0, %v66_v10 }
  0x93   :  { %v81_v13 = vpack.c.bf16 %v79_v12, %v79_v12 }
  0x95   :  { %84 = vst.msk [vmem:[%s154_s3] sm:$0xf] %vm83_vm2, %v81_v13 }
  0x98   :  { %v74_v14 = vld [vmem:[#allocation2 + $0x8] sm:$0xff] }
  0x99   :  { %v80_v15 = vadd.f32 %v107_v8, %v74_v14 }
  0x9b   :  { %v82_v16 = vpack.c.bf16 %v80_v15, %v80_v15 }
  0x9d   :  { %85 = vst.msk [vmem:[%s154_s3 + $0x4] sm:$0xf] %vm83_vm2, %v82_v16 }

// kernel: transformer_forward.53
= control target key start
LH: loop header
LB: loop body
LE: loop exit
PB: predicated region body
PF: predicated region fallthrough
CT: control target
= control target key end

     0   :  { %s474_s12 = smov 0   ;;  %s513_s0 = inlined_call_operand.vmem [shape: bf16[2,8,32], index: 0, kind: input, shape index: {}]   ;;  %s514_s1 = inlined_call_operand.vmem [shape: bf16[2,8,64], index: 1, kind: input, shape index: {}]   ;;  %s515_s2 = inlined_call_operand.vmem [shape: f32[2,1,8], index: 2, kind: input, shape index: {}]   ;;  %s516_s3 = inlined_call_operand.vmem [shape: bf16[2,8,32], index: 3, kind: output, shape index: {}]  }
   0x1 LB: > { %s407_s13 = sadd.s32 4294967295, %s448_s12   ;;  %p411_p0 = scmp.ge.s32.totalorder %s448_s12, 1  ;;  %s448_s12 = sphi %s474_s12, %s13_s12  }
   0x2   : > { %p153_p1 = scmp.lt.s32.totalorder %s448_s12, 3 }
   0x4   : > { %p154_p2 = pnand %p411_p0, %p153_p1 }
   0x5   : > { %p182_p3 = scmp.lt.s32.totalorder (!%p154_p2), %s407_s13, 1  ;;  %s450_s21 = smov (!%p154_p2), 112  }
   0x6   : > { %157 = sbr.rel (%p154_p2) target bundleno = 762 (0x2fa), region = 32  ;;  %s451_s25 = smov (!%p154_p2), 96  }
   0x7   : > { %s452_s26 = smov (!%p154_p2), 80   ;;  %s453_s27 = smov (!%p154_p2), 16  }
   0xb   : > { %s518_s13 = smov (!%p182_p3, %s407_s13), 1  ;;  %vm201_vm0 = vcmask 130048   ;;  %vm226_vm1 = vcmask 64512   ;;  %vm247_vm2 = vcmask 1043456   ;;  %vm331_vm3 = vcmask 257024  }
   0xc   : > { %s482_s14 = sshll.u32 %s518_s13, 2  ;;  %s192_s24 = scalar_lea.vmem %s515_s2, %s518_s13 }
   0xd   : > { %s189_s17 = scalar_lea.vmem %s514_s1, %s482_s14  ;;  %s185_s20 = scalar_lea.vmem %s513_s0, %s482_s14  ;;  %v433_v12 = vld [vmem:[%s192_s24] ss:$0 sm:$0xff] }
   0xe   : > { %v199_v0 = vld [vmem:[%s189_s17] sm:$0xf]  ;;  %s196_s30 = scalar_lea.vmem %s516_s3, %s482_s14 }
   0xf   : > { %v240_v1 = vunpack.c.l.b16 %v199_v0  ;;  %v198_v2 = vld [vmem:[%s185_s20] sm:$0xf]  ;;  %v206_v6 = vsel %vm201_vm0, %v199_v0, 0 }
  0x10   : > { %v265_v4 = vunpack.c.l.b16 %v198_v2  ;;  %215 = vmatpush.bf16.xpose.msra.mxu0 %v206_v6 }
  0x11   : > { %v241_v3 = vpack.c.b16 %v240_v1, %v240_v1 }
  0x12   : > { %v266_v5 = vpack.c.b16 %v265_v4, %v265_v4 }
  0x13   : > { %269 = vrot.lane.b32.xlu0 %v241_v3, %s450_s21 }
  0x17   : > { %415 = vmatmul.msk.bf16.vlgmr.msra.gmra.mxu0 %vm201_vm0, %v198_v2 }
  0x1b   : > { %267 = vrot.lane.b32.xlu0 %v266_v5, %s450_s21 }
  0x85   : > { %v270_v7 = vpop.permute.xlu0 %269 }
  0x86   : > { %v275_v8 = vsel %vm201_vm0, %v270_v7, 0 }
  0x87   : > { %284 = vmatpush.bf16.xpose.msra.mxu2 %v275_v8 }
  0x8d   : > { %v268_v9 = vpop.permute.xlu0 %267 }
  0x8e   : > { %417 = vmatmul.msk.bf16.vlgmr.msra.gmra.mxu2 %vm201_vm0, %v268_v9 }
  0x94   : > { %v217_v10 = vpop.f32.mrf.mxu0 }
  0x95   : > { %v221_v16 = vmul.f32 0.25, %v217_v10 }
  0x97   : > { %v225_v18 = vadd.f32 %v433_v12, %v221_v16 }
  0x99   : > { %v227_v20 = vsel %vm226_vm1, %v225_v18, -inf }
  0x9c   : > { %v219_v11 = vpop.f32.mrf.mxu0 }
 0x111   : > { %v286_v13 = vpop.f32.mrf.mxu2 }
 0x112   : > { %v290_v14 = vmul.f32 0.25, %v286_v13 }
 0x114   : > { %v291_v15 = vadd.f32 %v433_v12, %v290_v14 }
 0x116   : > { %v292_v17 = vsel %vm226_vm1, %v291_v15, -inf }
 0x117   : > { %293 = vmax.xlane.f32.xlu1 %v292_v17 }
 0x119   : > { %v288_v19 = vpop.f32.mrf.mxu2 }
 0x11f   : > { %228 = vmax.xlane.f32.xlu1 %v227_v20 }
 0x138   : > { %242 = vrot.lane.b32.xlu1 %v241_v3, %s451_s25 }
 0x18a   : > { %v294_v21 = vpop.xlane.xlu1 %293 }
 0x18b   : > { %v295_v22 = vsub.f32 %v291_v15, %v294_v21 }
 0x18d   : > { %v296_v23 = vmul.f32 1.442695, %v295_v22 }
 0x18f   : > { %434 = vpow2.f32 %v296_v23 }
 0x192   : > { %v229_v24 = vpop.xlane.xlu1 %228 }
 0x193   : > { %v230_v25 = vsub.f32 %v225_v18, %v229_v24 }
 0x195   : > { %v435_v26 = vpop.eup %434  ;;  %v231_v27 = vmul.f32 1.442695, %v230_v25 }
 0x196   : > { %v298_v28 = vsel %vm226_vm1, %v435_v26, 0.0 }
 0x197   : > { %436 = vpow2.f32 %v231_v27  ;;  %299 = vadd.xlane.f32.xlu2 %v298_v28 }
 0x19d   : > { %v437_v29 = vpop.eup %436 }
 0x19e   : > { %v233_v30 = vsel %vm226_vm1, %v437_v29, 0.0 }
 0x19f   : > { %234 = vadd.xlane.f32.xlu0 %v233_v30 }
 0x1aa   : > { %v243_v31 = vpop.permute.xlu1 %242 }
 0x1ab   : > { %v249_v32 = vsel %vm247_vm2, %v243_v31, 0 }
 0x1ac   : > { %258 = vmatpush.bf16.msra.mxu1 %v249_v32 }
 0x1af   : > { %304 = vrot.lane.b32.xlu2 %v241_v3, %s452_s26 }
 0x20a   : > { %v300_v33 = vpop.xlane.xlu2 %299 }
 0x20b   : > { %438 = vrcp.f32 %v300_v33 }
 0x211   : > { %v439_v34 = vpop.eup %438 }
 0x212   : > { %v305_v35 = vpop.permute.xlu2 %304  ;;  %v235_v36 = vpop.xlane.xlu0 %234  ;;  %v302_v37 = vmul.f32 %v439_v34, %v435_v26 }
 0x213   : > { %440 = vrcp.f32 %v235_v36  ;;  %v310_v38 = vsel %vm247_vm2, %v305_v35, 0 }
 0x214   : > { %319 = vmatpush.bf16.msra.mxu3 %v310_v38  ;;  %v303_v39 = vpack.c.bf16 %v302_v37, %v302_v37 }
 0x217   : > { %418 = vmatmul.msk.bf16.vlgmr.msra.gmra.mxu3 %vm226_vm1, %v303_v39 }
 0x219   : > { %v441_v40 = vpop.eup %440 }
 0x21a   : > { %v237_v41 = vmul.f32 %v441_v40, %v437_v29 }
 0x21c   : > { %v238_v42 = vpack.c.bf16 %v237_v41, %v237_v41 }
 0x21e   : > { %416 = vmatmul.msk.bf16.vlgmr.msra.gmra.mxu1 %vm226_vm1, %v238_v42 }
 0x29a   : > { %v321_v43 = vpop.f32.mrf.mxu3 }
 0x29b   : > { %326 = vrot.lane.b32.xlu2 %v321_v43, %s453_s27  ;;  %v260_v44 = vpop.f32.mrf.mxu1 }
 0x2a2   : > { %v323_v45 = vpop.f32.mrf.mxu3 }
 0x2a3   : > { %v262_v46 = vpop.f32.mrf.mxu1 }
 0x2f5   : > { %v327_v47 = vpop.permute.xlu2 %326 }
 0x2f6   : > { %v329_v48 = vsel %vm201_vm0, %v260_v44, %v327_v47 }
 0x2f7   : > { %v330_v49 = vpack.c.bf16 %v329_v48, %v329_v48 }
 0x2f9   : > { %332 = vst.msk [vmem:[%s196_s30] sm:$0xf] %vm331_vm3, %v330_v49 }
 0x2fa PF: > { %s13_s12 = sadd.s32 1, %s448_s12  }
 0x2fb   : > { %p10_p4 = scmp.ge.s32.totalorder %s13_s12, 4  }
 0x2fd   :  { %12 = sbr.rel (!%p10_p4) target bundleno = 1 (0x1), region = 68 }

// kernel: transformer_forward.69
= control target key start
LH: loop header
LB: loop body
LE: loop exit
PB: predicated region body
PF: predicated region fallthrough
CT: control target
= control target key end

     0   :  { %vm20_vm0 = vcmask 523264   ;;  %v149_v1 = vmov 0.0   ;;  %s194_s0 = inlined_call_operand.vmem [shape: bf16[16,32], index: 0, kind: input, shape index: {}]   ;;  %s195_s1 = inlined_call_operand.vmem [shape: bf16[32,64], index: 1, kind: input, shape index: {}]   ;;  %s196_s2 = inlined_call_operand.vmem [shape: f32[1,64], index: 2, kind: input, shape index: {}]   ;;  %s197_s3 = inlined_call_operand.hbm [shape: f32[16,64], index: 3, kind: output, shape index: {}]  }
   0x1   :  { %v117_v0 = vld [vmem:[%s195_s1 + $0x8] sm:$0xff]  ;;  %21 = vst.msk [vmem:[#allocation2] sm:$0xff] %vm20_vm0, %v149_v1 }
   0x2   :  { %8 = vsyncpa [#allocation4], 0  ;;  %58 = vmatpush.bf16.msra.mxu0 %v117_v0  ;;  %v116_v2 = vld [vmem:[%s195_s1] sm:$0xff]  ;;  %22 = vst.msk [vmem:[#allocation2 + $0x8] sm:$0xff] %vm20_vm0, %v149_v1  ;;  %vm48_vm1 = vcmask 261120   ;;  %s90_s22 = sshll.u32 %s197_s3, 4  ;;  %s91_s22 = int_to_ptr.hbm [resolvable:$true] %s90_s22 }
   0x3   :  { %v115_v3 = vld [vmem:[%s194_s0] sm:$0xff]  ;;  %s150_s0 = smov [#allocation3]   ;;  %s152_s23 = smov 8  }
   0x4   :  { %v122_v8 = vld [vmem:[%s196_s2] ss:$0 sm:$0xff]  ;;  %s88_s1 = sshll.u32 %s150_s0, 4  ;;  %s151_s2 = smov 128   ;;  %s89_s1 = int_to_ptr.vmem [resolvable:$true] %s88_s1 }
   0x6   :  { %59 = vmatpush.bf16.msra.mxu0 %v116_v2 }
   0x8   :  { %v23_v4 = vld [vmem:[#allocation2] sm:$0xff] }
   0x9   :  { %114 = vmatmul.msk.bf16.vlgmr.msra.gmra.mxu0 %vm48_vm1, %v115_v3  ;;  %v24_v7 = vld [vmem:[#allocation2 + $0x8] sm:$0xff] }
  0x86   :  { %v61_v5 = vpop.f32.mrf.mxu0 }
  0x87   :  { %v66_v6 = vadd.f32 %v61_v5, %v23_v4 }
  0x89   :  { %69 = vst.msk [vmem:[#allocation2] sm:$0xff] %vm20_vm0, %v66_v6 }
  0x8e   :  { %v63_v9 = vpop.f32.mrf.mxu0 }
  0x8f   :  { %v67_v10 = vadd.f32 %v63_v9, %v24_v7 }
  0x90   :  { %v74_v11 = vld [vmem:[#allocation2] sm:$0xff] }
  0x91   :  { %70 = vst.msk [vmem:[#allocation2 + $0x8] sm:$0xff] %vm20_vm0, %v67_v10  ;;  %v80_v12 = vadd.f32 %v122_v8, %v74_v11 }
  0x93   :  { %82 = vst.msk [vmem:[#allocation3] sm:$0xff] %vm20_vm0, %v80_v12 }
  0x98   :  { %v75_v13 = vld [vmem:[#allocation2 + $0x8] sm:$0xff] }
  0x99   :  { %v81_v14 = vadd.f32 %v122_v8, %v75_v13 }
  0x9b   :  { %83 = vst.msk [vmem:[#allocation3 + $0x8] sm:$0xff] %vm20_vm0, %v81_v14 }
  0x9c   :  { %96 = dma.vmem_to_hbm [thread:$0]  %s89_s1, 256, %s91_s22, [#allocation4], %s151_s2, %s151_s2, %s152_s23  }
  0x9d   :  { %147 = dma.done.wait [#allocation4], 256  }
  0x9e   :  { %148 = vsyncadd [#allocation4], 4294967040 }
  0x9f   :  { %101 = vsyncpa [#allocation4], 1 }

</bundles_post_ra>
